<compile_context>
chip_gen: v6e
topology: v6e:2x2x1
jax: 0.10.0
libtpu: 0.0.40
codegen_flags: <defaults>
</compile_context>

<pallas_src>
import jax
import jax.numpy as jnp
from jax.experimental import pallas as pl
from jax.experimental.pallas import tpu as pltpu


def _round_up(v, m):
    return ((v + m - 1) // m) * m


def sage_kernel(adj_ref, xn_ref, xs_ref, deg_ref, w_ref, b_ref, o_ref, acc_ref):
    """Grid axis 0 = output-row tiles (parallel), axis 1 = neighbor blocks (reduction)."""
    k = pl.program_id(1)

    @pl.when(k == 0)
    def _init():
        acc_ref[...] = jnp.zeros_like(acc_ref)

    # Partial neighbor sum for this (row tile, neighbor block): bf16 MXU, f32 accumulate.
    acc_ref[...] += jnp.dot(adj_ref[...], xn_ref[...],
                            preferred_element_type=jnp.float32)

    @pl.when(k == pl.num_programs(1) - 1)
    def _finalize():
        # Mean aggregation: divide the neighbor sum by the clamped in-degree, in f32.
        aggr = acc_ref[...] / jnp.maximum(deg_ref[...], 1.0)               # (tm, Cin_pad)
        xs = xs_ref[...].astype(jnp.float32)                               # (tm, Cin_pad)

        # Fused projection: one MXU contraction over [aggr | x] with [W_l ; W_r].
        feat = jnp.concatenate([aggr, xs], axis=-1)                        # (tm, 2*Cin_pad)
        h = jnp.dot(feat, w_ref[...], preferred_element_type=jnp.float32)  # (tm, Cout_pad)
        h = h + b_ref[...]

        # F.normalize(h, p=2, dim=-1) with torch eps=1e-12  ==  h * rsqrt(max(sumsq, eps^2)).
        # (Padded weight/bias columns are zero, so they contribute nothing to sumsq.)
        sumsq = jnp.sum(h * h, axis=-1, keepdims=True)
        h = h * jax.lax.rsqrt(jnp.maximum(sumsq, 1e-24))

        o_ref[...] = jnp.maximum(h, 0.0).astype(o_ref.dtype)


def graphsage_forward(x, edge_index, w_l, w_r, b_l, *, tm=128, tk=128):
    """x: (N, Cin) f32; edge_index: (2, E) int32 rows (src, dst).
    w_l, w_r: (Cin, Cout) pre-transposed for right-multiplication; b_l: (Cout,)."""
    N, Cin = x.shape
    Cout = w_l.shape[1]

    n_tile = max(tm, tk)
    N_pad = _round_up(N, n_tile)
    Cin_pad = _round_up(Cin, 128)      # lane-dense MXU K blocks
    Cout_pad = _round_up(Cout, 128)    # lane-dense output stores (unmasked vst)

    # ---- O(E)/O(N) glue: 0/1 edge-count adjacency (bf16-exact) + f32 in-degree vector ----
    src = edge_index[0]
    dst = edge_index[1]
    A = jnp.zeros((N_pad, N_pad), jnp.float32).at[dst, src].add(1.0)
    deg = jnp.sum(A, axis=1, keepdims=True)                    # (N_pad, 1) f32
    A = A.astype(jnp.bfloat16)                                 # dominant HBM traffic -> bf16

    x_pad = jnp.zeros((N_pad, Cin_pad), jnp.float32).at[:N, :Cin].set(x)
    x_bf16 = x_pad.astype(jnp.bfloat16)

    # Fused weight [W_l ; W_r] and bias, zero-padded to lane-dense shapes (kept f32).
    w_fused = jnp.zeros((2 * Cin_pad, Cout_pad), jnp.float32)
    w_fused = w_fused.at[:Cin, :Cout].set(w_l)
    w_fused = w_fused.at[Cin_pad:Cin_pad + Cin, :Cout].set(w_r)
    b2d = jnp.zeros((1, Cout_pad), jnp.float32).at[0, :Cout].set(b_l)

    grid = (N_pad // tm, N_pad // tk)   # (row tiles, neighbor blocks) -- reduction axis last

    out = pl.pallas_call(
        sage_kernel,
        out_shape=jax.ShapeDtypeStruct((N_pad, Cout_pad), jnp.float32),
        grid_spec=pltpu.PrefetchScalarGridSpec(
            num_scalar_prefetch=0,
            grid=grid,
            in_specs=[
                pl.BlockSpec((tm, tk), lambda i, k: (i, k)),                 # adjacency tile (streamed)
                pl.BlockSpec((tk, Cin_pad), lambda i, k: (k, 0)),            # neighbor features
                pl.BlockSpec((tm, Cin_pad), lambda i, k: (i, 0)),            # self features
                pl.BlockSpec((tm, 1), lambda i, k: (i, 0)),                  # in-degree
                pl.BlockSpec((2 * Cin_pad, Cout_pad), lambda i, k: (0, 0)),  # fused weights (resident)
                pl.BlockSpec((1, Cout_pad), lambda i, k: (0, 0)),            # bias (resident)
            ],
            out_specs=pl.BlockSpec((tm, Cout_pad), lambda i, k: (i, 0)),
            scratch_shapes=[pltpu.VMEM((tm, Cin_pad), jnp.float32)],         # f32 aggr accumulator
        ),
        compiler_params=pltpu.CompilerParams(
            dimension_semantics=("parallel", "arbitrary"),
            # Sized conservatively so it is valid on v7x (64 MiB physical VMEM) while still
            # raising v5e's 16 MiB default; the double-buffered working set here is ~1 MiB.
            vmem_limit_bytes=32 * 1024 * 1024,
        ),
    )(A, x_bf16, x_bf16, deg, w_fused, b2d)

    return out[:N, :Cout]


def _reference(x, edge_index, w_l, w_r, b_l):
    """Pure-JAX f32 reference mirroring PyG SAGEConv(normalize=True, aggr='mean') + relu."""
    N = x.shape[0]
    src, dst = edge_index[0], edge_index[1]
    A = jnp.zeros((N, N), jnp.float32).at[dst, src].add(1.0)
    deg = jnp.sum(A, axis=1, keepdims=True)
    aggr = (A / jnp.maximum(deg, 1.0)) @ x
    h = aggr @ w_l + x @ w_r + b_l[None, :]
    norm = jnp.sqrt(jnp.sum(h * h, axis=-1, keepdims=True))
    h = h / jnp.maximum(norm, 1e-12)
    return jnp.maximum(h, 0.0)


if __name__ == "__main__":
    # small, deterministic example (N not a tile multiple to exercise the padding path)
    N = 200           # number of graph nodes
    IN_CH = 8         # in_channels
    OUT_CH = 32       # out_channels

    key = jax.random.PRNGKey(0)
    kx, ke, kwl, kwr, kbl = jax.random.split(key, 5)

    x = jax.random.normal(kx, (N, IN_CH), dtype=jnp.float32)

    # deterministic edge_index (2, E): a ring (i -> i+1) plus random extra edges
    ring_src = jnp.arange(N, dtype=jnp.int32)
    ring_dst = (ring_src + 1) % N
    extra = jax.random.randint(ke, (2, 4 * N), 0, N, dtype=jnp.int32)
    edge_index = jnp.concatenate(
        [jnp.stack([ring_src, ring_dst], axis=0), extra], axis=1)   # (2, 1000)

    # SAGEConv parameters, stored pre-transposed as (in, out) for right-multiplication.
    scale = 1.0 / jnp.sqrt(jnp.float32(IN_CH))
    w_l = jax.random.uniform(kwl, (IN_CH, OUT_CH), jnp.float32, -scale, scale)
    w_r = jax.random.uniform(kwr, (IN_CH, OUT_CH), jnp.float32, -scale, scale)
    b_l = jax.random.uniform(kbl, (OUT_CH,), jnp.float32, -scale, scale)

    out = graphsage_forward(x, edge_index, w_l, w_r, b_l)
    out = jax.block_until_ready(out)

    ref = _reference(x, edge_index, w_l, w_r, b_l)
    assert out.shape == (N, OUT_CH)
    max_err = float(jnp.max(jnp.abs(out - ref)))
    # bf16 streaming of adjacency/features (with f32 accumulation) vs pure-f32 reference.
    assert jnp.allclose(out, ref, atol=2e-2, rtol=2e-2), f"mismatch vs reference (max_abs_err={max_err})"

    print("KERNEL_OK")
</pallas_src>

<mosaic_0001>
module attributes {stable_mosaic.version = 11 : i64} {
  func.func @sage_kernel(%arg0: i32, %arg1: i32, %arg2: memref<128x128xbf16, #tpu.memory_space<vmem>>, %arg3: memref<128x128xbf16, #tpu.memory_space<vmem>>, %arg4: memref<128x128xbf16, #tpu.memory_space<vmem>>, %arg5: memref<128x1xf32, #tpu.memory_space<vmem>>, %arg6: memref<256x128xf32, #tpu.memory_space<vmem>>, %arg7: memref<1x128xf32, #tpu.memory_space<vmem>>, %arg8: memref<128x128xf32, #tpu.memory_space<vmem>>, %arg9: memref<128x128xf32, #tpu.memory_space<vmem>>) attributes {dimension_semantics = [#tpu.dimension_semantics<parallel>, #tpu.dimension_semantics<arbitrary>], iteration_bounds = array<i64: 2, 2>, scalar_prefetch = 0 : i64, scratch_operands = 1 : i64, tpu.core_type = #tpu.core_type<tc>, window_params = [{transform_indices = @transform_0, window_bounds = array<i64: 128, 128>}, {transform_indices = @transform_1, window_bounds = array<i64: 128, 128>}, {transform_indices = @transform_2, window_bounds = array<i64: 128, 128>}, {transform_indices = @transform_3, window_bounds = array<i64: 128, 1>}, {pipeline_mode = #tpu.pipeline_mode<synchronous>, transform_indices = @transform_4, window_bounds = array<i64: 256, 128>}, {pipeline_mode = #tpu.pipeline_mode<synchronous>, transform_indices = @transform_5, window_bounds = array<i64: 1, 128>}, {transform_indices = @transform_6, window_bounds = array<i64: 128, 128>}]} {
    %c0_i32 = arith.constant 0 : i32
    %0 = arith.cmpi eq, %arg1, %c0_i32 : i32
    %1 = arith.extui %0 : i1 to i32
    %c0_i32_0 = arith.constant 0 : i32
    %2 = arith.cmpi ne, %1, %c0_i32_0 : i32
    scf.if %2 {
      %cst_9 = arith.constant 0.000000e+00 : f32
      %12 = vector.broadcast %cst_9 : f32 to vector<128x128xf32>
      %c0_10 = arith.constant 0 : index
      %c0_11 = arith.constant 0 : index
      %13 = vector.load %arg9[%c0_10, %c0_11] : memref<128x128xf32, #tpu.memory_space<vmem>>, vector<128x128xf32>
      tpu.vector_store %arg9[%c0_10, %c0_11], %12 {strides = array<i32>} : memref<128x128xf32, #tpu.memory_space<vmem>>, vector<128x128xf32>,
    } else {
    }
    %c0 = arith.constant 0 : index
    %c0_1 = arith.constant 0 : index
    %3 = vector.load %arg9[%c0, %c0_1] : memref<128x128xf32, #tpu.memory_space<vmem>>, vector<128x128xf32>
    %c0_2 = arith.constant 0 : index
    %c0_3 = arith.constant 0 : index
    %4 = vector.load %arg2[%c0_2, %c0_3] : memref<128x128xbf16, #tpu.memory_space<vmem>>, vector<128x128xbf16>
    %c0_4 = arith.constant 0 : index
    %c0_5 = arith.constant 0 : index
    %5 = vector.load %arg3[%c0_4, %c0_5] : memref<128x128xbf16, #tpu.memory_space<vmem>>, vector<128x128xbf16>
    %cst = arith.constant dense<0.000000e+00> : vector<128x128xf32>
    %6 = tpu.matmul %4, %5, %cst {dimension_numbers = #tpu.dot_dimension_numbers<[1], [0], [0], [1], [0, 0, 1, 1], [], []>} : vector<128x128xbf16>, vector<128x128xbf16>, vector<128x128xf32> -> vector<128x128xf32>
    %7 = arith.addf %3, %6 : vector<128x128xf32>
    %c0_6 = arith.constant 0 : index
    %c0_7 = arith.constant 0 : index
    %8 = vector.load %arg9[%c0_6, %c0_7] : memref<128x128xf32, #tpu.memory_space<vmem>>, vector<128x128xf32>
    tpu.vector_store %arg9[%c0_6, %c0_7], %7 {strides = array<i32>} : memref<128x128xf32, #tpu.memory_space<vmem>>, vector<128x128xf32>,
    %c1_i32 = arith.constant 1 : i32
    %9 = arith.cmpi eq, %arg1, %c1_i32 : i32
    %10 = arith.extui %9 : i1 to i32
    %c0_i32_8 = arith.constant 0 : i32
    %11 = arith.cmpi ne, %10, %c0_i32_8 : i32
    scf.if %11 {
      %c0_9 = arith.constant 0 : index
      %c0_10 = arith.constant 0 : index
      %12 = vector.load %arg9[%c0_9, %c0_10] : memref<128x128xf32, #tpu.memory_space<vmem>>, vector<128x128xf32>
      %c0_11 = arith.constant 0 : index
      %c0_12 = arith.constant 0 : index
      %13 = vector.load %arg5[%c0_11, %c0_12] : memref<128x1xf32, #tpu.memory_space<vmem>>, vector<128x1xf32>
      %cst_13 = arith.constant 1.000000e+00 : f32
      %14 = vector.broadcast %cst_13 : f32 to vector<128x1xf32>
      %15 = arith.maximumf %13, %14 : vector<128x1xf32>
      %16 = vector.broadcast %15 : vector<128x1xf32> to vector<128x128xf32>
      %17 = arith.divf %12, %16 : vector<128x128xf32>
      %c0_14 = arith.constant 0 : index
      %c0_15 = arith.constant 0 : index
      %18 = vector.load %arg4[%c0_14, %c0_15] : memref<128x128xbf16, #tpu.memory_space<vmem>>, vector<128x128xbf16>
      %19 = arith.extf %18 : vector<128x128xbf16> to vector<128x128xf32>
      %20 = tpu.concatenate %17, %19 in 1 : vector<128x128xf32>, vector<128x128xf32> -> vector<128x256xf32>
      %c0_16 = arith.constant 0 : index
      %c0_17 = arith.constant 0 : index
      %21 = vector.load %arg6[%c0_16, %c0_17] : memref<256x128xf32, #tpu.memory_space<vmem>>, vector<256x128xf32>
      %cst_18 = arith.constant dense<0.000000e+00> : vector<128x128xf32>
      %22 = tpu.matmul %20, %21, %cst_18 {dimension_numbers = #tpu.dot_dimension_numbers<[1], [0], [0], [1], [0, 0, 1, 1], [], []>} : vector<128x256xf32>, vector<256x128xf32>, vector<128x128xf32> -> vector<128x128xf32>
      %c0_19 = arith.constant 0 : index
      %c0_20 = arith.constant 0 : index
      %23 = vector.load %arg7[%c0_19, %c0_20] : memref<1x128xf32, #tpu.memory_space<vmem>>, vector<1x128xf32>
      %24 = vector.broadcast %23 : vector<1x128xf32> to vector<128x128xf32>
      %25 = arith.addf %22, %24 : vector<128x128xf32>
      %26 = arith.mulf %25, %25 : vector<128x128xf32>
      %cst_21 = arith.constant dense<0.000000e+00> : vector<128xf32>
      %27 = vector.multi_reduction <add>, %26, %cst_21 [1] : vector<128x128xf32> to vector<128xf32>
      %28 = vector.shape_cast %27 : vector<128xf32> to vector<128x1xf32>
      %cst_22 = arith.constant 1.000000e-24 : f32
      %29 = vector.broadcast %cst_22 : f32 to vector<128x1xf32>
      %30 = arith.maximumf %28, %29 : vector<128x1xf32>
      %31 = math.rsqrt %30 : vector<128x1xf32>
      %32 = vector.broadcast %31 : vector<128x1xf32> to vector<128x128xf32>
      %33 = arith.mulf %25, %32 : vector<128x128xf32>
      %cst_23 = arith.constant 0.000000e+00 : f32
      %34 = vector.broadcast %cst_23 : f32 to vector<128x128xf32>
      %35 = arith.maximumf %33, %34 : vector<128x128xf32>
      %c0_24 = arith.constant 0 : index
      %c0_25 = arith.constant 0 : index
      %36 = vector.load %arg8[%c0_24, %c0_25] : memref<128x128xf32, #tpu.memory_space<vmem>>, vector<128x128xf32>
      tpu.vector_store %arg8[%c0_24, %c0_25], %35 {strides = array<i32>} : memref<128x128xf32, #tpu.memory_space<vmem>>, vector<128x128xf32>,
    } else {
    }
    return
  }
  func.func @transform_0(%arg0: i32, %arg1: i32) -> (i32, i32) {
    %c0_i32 = arith.constant 0 : i32
    return %arg0, %arg1 : i32, i32
  }
  func.func @transform_1(%arg0: i32, %arg1: i32) -> (i32, i32) {
    %c0_i32 = arith.constant 0 : i32
    %c0_i32_0 = arith.constant 0 : i32
    return %arg1, %c0_i32 : i32, i32
  }
  func.func @transform_2(%arg0: i32, %arg1: i32) -> (i32, i32) {
    %c0_i32 = arith.constant 0 : i32
    %c0_i32_0 = arith.constant 0 : i32
    return %arg0, %c0_i32 : i32, i32
  }
  func.func @transform_3(%arg0: i32, %arg1: i32) -> (i32, i32) {
    %c0_i32 = arith.constant 0 : i32
    %c0_i32_0 = arith.constant 0 : i32
    return %arg0, %c0_i32 : i32, i32
  }
  func.func @transform_4(%arg0: i32, %arg1: i32) -> (i32, i32) {
    %c0_i32 = arith.constant 0 : i32
    %c0_i32_0 = arith.constant 0 : i32
    %c0_i32_1 = arith.constant 0 : i32
    return %c0_i32, %c0_i32_0 : i32, i32
  }
  func.func @transform_5(%arg0: i32, %arg1: i32) -> (i32, i32) {
    %c0_i32 = arith.constant 0 : i32
    %c0_i32_0 = arith.constant 0 : i32
    %c0_i32_1 = arith.constant 0 : i32
    return %c0_i32, %c0_i32_0 : i32, i32
  }
  func.func @transform_6(%arg0: i32, %arg1: i32) -> (i32, i32) {
    %c0_i32 = arith.constant 0 : i32
    %c0_i32_0 = arith.constant 0 : i32
    return %arg0, %c0_i32 : i32, i32
  }
}

</mosaic_0001>

<bundles_post_ra>
// kernel: tpu_custom_call.1
= control target key start
LH: loop header
LB: loop body
LE: loop exit
PB: predicated region body
PF: predicated region fallthrough
CT: control target
= control target key end

     0   :  { %s2695_s0 = inlined_call_operand.vmem [shape: bf16[256,256], index: 0, kind: input, shape index: {}]   ;;  %s2696_s1 = inlined_call_operand.hbm [shape: bf16[256,128], index: 1, kind: input, shape index: {}]   ;;  %s2697_s2 = inlined_call_operand.hbm [shape: bf16[256,128], index: 2, kind: input, shape index: {}]   ;;  %s2698_s3 = inlined_call_operand.vmem [shape: f32[256,1], index: 3, kind: input, shape index: {}]   ;;  %s2699_s4 = inlined_call_operand.hbm [shape: f32[256,128], index: 4, kind: input, shape index: {}]   ;;  %s2700_s5 = inlined_call_operand.vmem [shape: f32[1,128], index: 5, kind: input, shape index: {}]   ;;  %s2701_s6 = inlined_call_operand.hbm [shape: f32[256,128], index: 6, kind: output, shape index: {}]  }
   0x1   :  { %2718 = sst [smem:[#allocation27_spill]] %s2695_s0 }
   0x2   :  { %2719 = sst [smem:[#allocation28_spill]] %s2696_s1 }
   0x3   :  { %2720 = sst [smem:[#allocation29_spill]] %s2698_s3 }
   0x4   :  { %2721 = sst [smem:[#allocation30_spill]] %s2699_s4 }
   0x5   :  { %2722 = sst [smem:[#allocation31_spill]] %s2700_s5 }
   0x6   :  { %2723 = sst [smem:[#allocation32_spill]] %s2701_s6 }
   0x7   :  { %11 = vsyncpa [#allocation5], 0 }
   0x8   :  { %13 = vsyncpa [#allocation5 + $0x1], 0 }
   0x9   :  { %14 = vsyncpa [#allocation8], 0 }
   0xa   :  { %16 = vsyncpa [#allocation8 + $0x1], 0 }
   0xb   :  { %17 = vsyncpa [#allocation6], 0 }
   0xc   :  { %19 = vsyncpa [#allocation6 + $0x1], 0  ;;  %s2207_s21 = smov 0   ;;  %s2209_s22 = smov 0  }
   0xd   :  { %s2211_s23 = smov 0   ;;  %s2213_s24 = smov 0  }
   0xe   :  { %s2215_s25 = smov 0   ;;  %s2217_s26 = smov 0  }
   0xf   :  { %s2219_s27 = smov 0   ;;  %s2221_s28 = smov 0  }
  0x10   :  { %s2223_s29 = smov 0   ;;  %s2225_s30 = smov 0  }
  0x11   :  { %s2227_s7 = smov 0   ;;  %s2229_s8 = smov 0  }
  0x12   :  { %s2231_s9 = smov 0  }
  0x13 LB: > { %2724 = sst [smem:[#allocation15_spill]] %s2110_s21  ;;  %s2273_s10 = sadd.s32 4294967295, %s2158_s9   ;;  %s2158_s9 = sphi %s2231_s9, %s25_s9   ;;  %s2154_s8 = sphi %s2229_s8, %s2788_s8   ;;  %s2150_s7 = sphi %s2227_s7, %s2787_s7   ;;  %s2146_s30 = sphi %s2225_s30, %s2786_s30   ;;  %s2142_s29 = sphi %s2223_s29, %s2785_s29   ;;  %s2138_s28 = sphi %s2221_s28, %s2784_s28   ;;  %s2134_s27 = sphi %s2219_s27, %s2783_s27   ;;  %s2130_s26 = sphi %s2217_s26, %s2782_s26   ;;  %s2126_s25 = sphi %s2215_s25, %s2781_s25   ;;  %s2122_s24 = sphi %s2213_s24, %s2780_s24   ;;  %s2118_s23 = sphi %s2211_s23, %s2779_s23   ;;  %s2114_s22 = sphi %s2209_s22, %s2778_s22   ;;  %s2110_s21 = sphi %s2207_s21, %s2771_s21  }
  0x14   : > { %2725 = sst [smem:[#allocation16_spill]] %s2114_s22  ;;  %s34_s12 = sadd.s32 1, %s2150_s7 }
  0x15   : > { %2726 = sst [smem:[#allocation17_spill]] %s2142_s29  ;;  %s37_s13 = sadd.s32 1, %s2154_s8 }
  0x16   : > { %2727 = sst [smem:[#allocation18_spill]] %s2146_s30  ;;  %p35_p0 = scmp.ge.s32.totalorder %s34_s12, 2 }
  0x17   : > { %s46_s14 = sadd.s32 1, %s2138_s28  ;;  %p53_p1 = scmp.ne.s32.totalorder %s2138_s28, %s2134_s27 }
  0x18   : > { %p54_p2 = scmp.eq.s32.totalorder %s2158_s9, 0  ;;  %s2790_s12 = smov (%p35_p0, %s34_s12), 0 }
  0x19   : > { %2728 = sst [smem:[#allocation19_spill]] %s2790_s12  ;;  %s2792_s13 = smov (!%p35_p0, %s37_s13), %s2154_s8 }
  0x1a   : > { %s42_s15 = ssub.s32 %s2150_s7, %s2790_s12  ;;  %p2289_p3 = por %p54_p2, %p53_p1 }
  0x1b   : > { %p39_p4 = scmp.ge.s32.totalorder %s2792_s13, 2  ;;  %p70_p5 = scmp.eq.s32.totalorder %s42_s15, 0 }
  0x1c   : > { %s72_s17 = sadd.s32 1, %s2130_s26  ;;  %p79_p6 = scmp.ne.s32.totalorder %s2130_s26, %s2126_s25 }
  0x1d   : > { %s2794_s13 = smov (%p39_p4, %s2792_s13), 0  ;;  %p85_p8 = scmp.ne.s32.totalorder %s2126_s25, %s2122_s24 }
  0x1e   : > { %2730 = sst [smem:[#allocation20_spill]] %s2794_s13  ;;  %s41_s19 = ssub.s32 %s2154_s8, %s2794_s13 }
  0x1f   : > { %s2299_s18 = scalar_select %p70_p5, %s2130_s26, %s72_s17  }
  0x20   : > { %p2305_p7 = por %p79_p6, %p54_p2  ;;  %s43_s11 = sor.u32 %s42_s15, %s41_s19 }
  0x21   : > { %2731 = sst [smem:[#allocation21_spill]] %s2299_s18  ;;  %p44_p9 = scmp.eq.s32.totalorder %s43_s11, 0 }
  0x22   : > { %s2732_s20 = scalar_select %p2305_p7, 1, 0 }
  0x23   : > { %p2706_p10 = scmp.eq.s32.totalorder %s2273_s10, 0  ;;  %p96_p11 = scmp.eq.s32.totalorder %s41_s19, 0 }
  0x24   : > { %s98_s12 = sadd.s32 1, %s2118_s23  ;;  %p105_p13 = scmp.ne.s32.totalorder %s2118_s23, %s2114_s22 }
  0x25   : > { %s2314_s6 = scalar_select %p44_p9, %s2138_s28, %s46_s14  }
  0x26   : > { %p2318_p12 = por %p2706_p10, %p85_p8  ;;  %p2329_p0 = por %p105_p13, %p54_p2 }
  0x27   : > { %2733 = sst [smem:[#allocation22_spill]] %s2314_s6  ;;  %p111_p1 = scmp.ne.s32.totalorder %s2114_s22, %s2110_s21 }
  0x28   : > { %s2734_s17 = scalar_select %p2318_p12, 1, 0 }
  0x29   : > { %s2325_s13 = scalar_select %p96_p11, %s2118_s23, %s98_s12  }
  0x2a   : > { %s2736_s15 = scalar_select %p2329_p0, 1, 0 }
  0x2b   : > { %2735 = sst [smem:[#allocation23_spill]] %s2325_s13  ;;  %p203_p4 = scmp.eq.s32.totalorder %s2273_s10, 3 }
  0x2c   : > { %s2737_s24 = sadd.s32 4294967294, %s2158_s9   ;;  %p2340_p6 = por %p111_p1, %p2706_p10 }
  0x2d   : > { %p209_p5 = scmp.eq.s32.totalorder %s2737_s24, 3  ;;  %p1456_p8 = scmp.ge.s32.totalorder %s2158_s9, 1 }
  0x2e   : > { %s2738_s11 = scalar_select %p2340_p6, 1, 0 }
  0x2f   : > { %p2345_p9 = por %p203_p4, %p105_p13  ;;  %p2349_p11 = por %p209_p5, %p111_p1 }
  0x30   : > { %2739 = sst [smem:[#allocation24_spill]] %s2738_s11  ;;  %p216_p2 = scmp.lt.s32.totalorder %s2158_s9, 5 }
  0x31   : > { %s2740_s14 = scalar_select %p2345_p9, 1, 0 }
  0x32   : > { %s2742_s12 = scalar_select %p2349_p11, 1, 0 }
  0x33   : > { %2741 = sst [smem:[#allocation25_spill]] %s2740_s14  ;;  %p2354_p12 = pnand %p1456_p8, %p216_p2 }
  0x34   : > { %2743 = sst [smem:[#allocation26_spill]] %s2742_s12  ;;  %s2160_s24 = smov [#allocation9]  }
  0x35   : > { %s228_s6 = sshll.u32 %s2160_s24, 4  ;;  %p1730_p10 = pneg %p2354_p12  ;;  %s229_s6 = int_to_ptr.vmem [resolvable:$true] %s228_s6 }
  0x36   : > { %p2745_p6 = scmp.eq.s32.totalorder %s2273_s10, 0  ;;  %s1947_s18 = scalar_lea.vmem %s229_s6, 4096 }
  0x37   : > { %p1948_p9 = scmp.ne.s32.totalorder %s229_s6, %s1947_s18  ;;  %p1955_p0 = scmp.lt.s32.totalorder %s229_s6, %s229_s6 }
  0x38   : > { %p1731_p13 = pnand %p1730_p10, %p2745_p6  ;;  %p1956_p11 = scmp.lt.s32.totalorder %s1947_s18, %s1947_s18 }
  0x3a   : > { %p1938_p4 = pneg %p1731_p13  ;;  %p1957_p7 = por %p1956_p11, %p1955_p0 }
  0x3c   : > { %p1950_p1 = pnand %p1948_p9, %p1938_p4 }
  0x3e   : > { %p1951_p5 = pneg %p1950_p1 }
  0x40   : > { %p1958_p8 = pnand %p1957_p7, %p1951_p5 }
  0x42   : > { %1961 = shalt.err (!%p1958_p8)
}
  0x43   : > { %s2161_s13 = smov 128   ;;  %s2162_s12 = smov 8  }
  0x44   : > { %s2746_s4 = sld [smem:[#allocation30_spill]]  ;;  %p1458_p2 = scmp.ge.s32.totalorder %s2158_s9, 4 }
  0x46   : > { %241 = sbr.rel (%p1458_p2) target bundleno = 128 (0x80), region = 24 }
  0x4a   : > { %1733 = dma.hbm_to_vmem [thread:$0]  (!%p1731_p13), %s2746_s4, 4096, %s229_s6, [#allocation8], %s2161_s13, %s2161_s13, %s2162_s12  }
  0x4b   : > { %244 = sbr.rel (!%p2289_p3) target bundleno = 95 (0x5f), region = 28  ;;  %s246_s24 = sand.u32 (%p2289_p3), 1, %s2138_s28  }
  0x4c   : > { %s1501_s18 = sshll.u32 (%p2289_p3), %s2154_s8, 5  ;;  %s1459_s5 = sshll.u32 (%p2289_p3), %s246_s24, 6 }
  0x4d   : > { %s251_s29 = sadd.s32 (%p2289_p3), %s2150_s7, %s1501_s18  ;;  %s2747_s0 = sld [smem:[#allocation27_spill]] (%p2289_p3) }
  0x4e   : > { %s1462_s3 = sshll.u32 (%p2289_p3), %s251_s29, 2  ;;  %s248_s6 = scalar_lea.vmem (%p2289_p3), [#allocation3], %s1459_s5 }
  0x53   : > { %s2374_s22 = scalar_lea.vmem %s2747_s0, %s1462_s3 }
  0x54   : > { %v270_v0 = vld [vmem:[%s2374_s22] sm:$0xf]  ;;  %v272_v1 = vld [vmem:[%s2374_s22 + $0x8] sm:$0xf]  ;;  %v274_v2 = vld [vmem:[%s2374_s22 + $0x10] sm:$0xf] }
  0x55   : > { %271 = vst [vmem:[%s248_s6] sm:$0xf] %v270_v0  ;;  %273 = vst [vmem:[%s248_s6 + $0x4] sm:$0xf] %v272_v1  ;;  %v276_v3 = vld [vmem:[%s2374_s22 + $0x18] sm:$0xf] }
  0x56   : > { %275 = vst [vmem:[%s248_s6 + $0x8] sm:$0xf] %v274_v2  ;;  %v278_v4 = vld [vmem:[%s2374_s22 + $0x20] sm:$0xf]  ;;  %v280_v5 = vld [vmem:[%s2374_s22 + $0x28] sm:$0xf] }
  0x57   : > { %277 = vst [vmem:[%s248_s6 + $0xc] sm:$0xf] %v276_v3  ;;  %279 = vst [vmem:[%s248_s6 + $0x10] sm:$0xf] %v278_v4  ;;  %v282_v6 = vld [vmem:[%s2374_s22 + $0x30] sm:$0xf] }
  0x58   : > { %281 = vst [vmem:[%s248_s6 + $0x14] sm:$0xf] %v280_v5  ;;  %v284_v7 = vld [vmem:[%s2374_s22 + $0x38] sm:$0xf]  ;;  %v286_v8 = vld [vmem:[%s2374_s22 + $0x40] sm:$0xf] }
  0x59   : > { %283 = vst [vmem:[%s248_s6 + $0x18] sm:$0xf] %v282_v6  ;;  %285 = vst [vmem:[%s248_s6 + $0x1c] sm:$0xf] %v284_v7  ;;  %v288_v9 = vld [vmem:[%s2374_s22 + $0x48] sm:$0xf] }
  0x5a   : > { %287 = vst [vmem:[%s248_s6 + $0x20] sm:$0xf] %v286_v8  ;;  %v290_v10 = vld [vmem:[%s2374_s22 + $0x50] sm:$0xf]  ;;  %v292_v11 = vld [vmem:[%s2374_s22 + $0x58] sm:$0xf] }
  0x5b   : > { %289 = vst [vmem:[%s248_s6 + $0x24] sm:$0xf] %v288_v9  ;;  %291 = vst [vmem:[%s248_s6 + $0x28] sm:$0xf] %v290_v10  ;;  %v294_v12 = vld [vmem:[%s2374_s22 + $0x60] sm:$0xf] }
  0x5c   : > { %293 = vst [vmem:[%s248_s6 + $0x2c] sm:$0xf] %v292_v11  ;;  %v296_v13 = vld [vmem:[%s2374_s22 + $0x68] sm:$0xf]  ;;  %v298_v14 = vld [vmem:[%s2374_s22 + $0x70] sm:$0xf] }
  0x5d   : > { %295 = vst [vmem:[%s248_s6 + $0x30] sm:$0xf] %v294_v12  ;;  %297 = vst [vmem:[%s248_s6 + $0x34] sm:$0xf] %v296_v13  ;;  %v300_v15 = vld [vmem:[%s2374_s22 + $0x78] sm:$0xf] }
  0x5e   : > { %299 = vst [vmem:[%s248_s6 + $0x38] sm:$0xf] %v298_v14  ;;  %301 = vst [vmem:[%s248_s6 + $0x3c] sm:$0xf] %v300_v15 }
  0x5f PF: > { %s358_s3 = sand.u32 1, %s2130_s26   ;;  %s1502_s5 = sshll.u32 %s2150_s7, 10 }
  0x60   : > { %s1463_s21 = sshll.u32 %s358_s3, 6  ;;  %s2748_s1 = sld [smem:[#allocation28_spill]] }
  0x61   : > { %s362_s16 = scalar_lea.vmem [#allocation4], %s1463_s21  ;;  %s359_s14 = scalar_lea.sflag [#allocation5], %s358_s3 }
  0x62   : > { %s369_s11 = sshll.u32 %s362_s16, 4  ;;  %p2749_p7 = scmp.ne.s32.totalorder %s2732_s20, 0  ;;  %s370_s11 = int_to_ptr.vmem [resolvable:$true] %s369_s11 }
  0x63   : > { %s1974_s12 = scalar_lea.vmem %s370_s11, 1024  ;;  %s2163_s22 = smov [#allocation4]  }
  0x64   : > { %p1975_p3 = scmp.ne.s32.totalorder %s370_s11, %s1974_s12  ;;  %s1978_s24 = sshll.u32 %s2163_s22, 4  ;;  %s1979_s24 = int_to_ptr.vmem [resolvable:$false] %s1978_s24 }
  0x65   : > { %s1980_s18 = scalar_lea.vmem %s1979_s24, 2048  ;;  %p1981_p6 = scmp.lt.s32.totalorder %s370_s11, %s1979_s24 }
  0x66   : > { %s368_s13 = scalar_lea.hbm %s2748_s1, %s1502_s5  ;;  %p1976_p10 = pnand %p1975_p3, %p2749_p7 }
  0x67   : > { %p1982_p9 = scmp.lt.s32.totalorder %s1980_s18, %s1974_s12 }
  0x68   : > { %p1977_p0 = pneg %p1976_p10 }
  0x69   : > { %p1983_p11 = por %p1982_p9, %p1981_p6 }
  0x6b   : > { %p1984_p13 = pnand %p1983_p11, %p1977_p0 }
  0x6d   : > { %1987 = shalt.err (!%p1984_p13)
}
  0x6e   : > { %s2164_s6 = smov 64   ;;  %s2165_s3 = smov 4  }
  0x6f   : > { %1722 = dma.hbm_to_vmem [thread:$0]  (%p2749_p7), %s368_s13, 1024, %s370_s11, %s359_s14, %s2164_s6, %s2164_s6, %s2165_s3  }
  0x70   : > { %s379_s5 = sand.u32 1, %s2158_s9   ;;  %s381_s21 = sand.u32 1, %s2118_s23  }
  0x71   : > { %s1466_s29 = sshll.u32 %s381_s21, 6  ;;  %s1503_s30 = sshll.u32 %s2154_s8, 10 }
  0x72   : > { %s389_s12 = scalar_lea.hbm %s2697_s2, %s1503_s30  ;;  %s383_s24 = scalar_lea.vmem [#allocation7], %s1466_s29 }
  0x73   : > { %s390_s18 = sshll.u32 %s383_s24, 4  ;;  %s380_s0 = scalar_lea.sflag [#allocation8], %s379_s5  ;;  %s391_s18 = int_to_ptr.vmem [resolvable:$true] %s390_s18 }
  0x74   : > { %s2000_s1 = scalar_lea.vmem %s391_s18, 1024  ;;  %p2750_p1 = scmp.ne.s32.totalorder %s2736_s15, 0 }
  0x75   : > { %p2001_p4 = scmp.ne.s32.totalorder %s391_s18, %s2000_s1  ;;  %s2166_s4 = smov [#allocation7]  }
  0x76   : > { %s2004_s20 = sshll.u32 %s2166_s4, 4  ;;  %s2005_s20 = int_to_ptr.vmem [resolvable:$false] %s2004_s20 }
  0x77   : > { %p2002_p5 = pnand %p2001_p4, %p2750_p1  ;;  %s2006_s13 = scalar_lea.vmem %s2005_s20, 2048 }
  0x78   : > { %p2007_p2 = scmp.lt.s32.totalorder %s391_s18, %s2005_s20  ;;  %p2008_p3 = scmp.lt.s32.totalorder %s2006_s13, %s2000_s1 }
  0x79   : > { %p2003_p8 = pneg %p2002_p5 }
  0x7a   : > { %p2009_p7 = por %p2008_p3, %p2007_p2 }
  0x7c   : > { %p2010_p10 = pnand %p2009_p7, %p2003_p8 }
  0x7e   : > { %2013 = shalt.err (!%p2010_p10)
}
  0x7f   : > { %1723 = dma.hbm_to_vmem [thread:$0]  (%p2750_p1), %s389_s12, 1024, %s391_s18, %s380_s0, %s2164_s6, %s2164_s6, %s2165_s3  }
  0x80 PF: > { %411 = sbr.rel (%p2354_p12) target bundleno = 982 (0x3d6), region = 81  ;;  %s414_s11 = sand.u32 (!%p2354_p12), 1, %s2134_s27  }
  0x81   : > { %s420_s14 = sand.u32 (!%p2354_p12), 1, %s2126_s25   ;;  %s1470_s4 = sshll.u32 (!%p2354_p12), %s414_s11, 6 }
  0x82   : > { %s1471_s5 = sshll.u32 (!%p2354_p12), %s420_s14, 6  ;;  %s2415_s21 = scalar_lea.vmem (!%p2354_p12), [#allocation3], %s1470_s4 }
  0x83   : > { %s421_s1 = scalar_lea.sflag (!%p2354_p12), [#allocation5], %s420_s14  ;;  %s2417_s29 = scalar_lea.vmem (!%p2354_p12), [#allocation4], %s1471_s5 }
  0x84   : > { %p2751_p0 = scmp.ne.s32.totalorder (!%p2354_p12), %s2734_s17, 0 }
  0x86   : > { %2093 = dma.done.wait (%p2751_p0), %s421_s1, 1024  }
  0x87   : > { %2095 = vsyncadd (%p2751_p0), %s421_s1, 4294966272  ;;  %s2752_s0 = sld [smem:[#allocation16_spill]]  ;;  %s429_s19 = sand.u32 1, %s2273_s10  }
  0x88   : > { %s2753_s15 = sld [smem:[#allocation24_spill]]  ;;  %s430_s3 = scalar_lea.sflag [#allocation8], %s429_s19 }
  0x8d   : > { %s2425_s6 = sand.u32 1, %s2752_s0  }
  0x8e   : > { %s1472_s27 = sshll.u32 %s2425_s6, 6  ;;  %p2754_p12 = scmp.ne.s32.totalorder %s2753_s15, 0 }
  0x8f   : > { %s2428_s30 = scalar_lea.vmem [#allocation7], %s1472_s27 }
  0x90   : > { %2097 = dma.done.wait (%p2754_p12), %s430_s3, 1024  }
  0x91   : > { %2099 = vsyncadd (%p2754_p12), %s430_s3, 4294966272  ;;  %p2755_p6 = scmp.eq.s32.totalorder %s2273_s10, 0 }
  0x93   : > { %2101 = dma.done.wait (%p2755_p6), [#allocation8], 4096   ;;  %p2756_p9 = pmov %p2755_p6 }
  0x94   : > { %s2757_s17 = sld [smem:[#allocation18_spill]]  ;;  %s1474_s16 = sshll.u32 %s2425_s6, 7 }
  0x95   : > { %2103 = vsyncadd (%p2756_p9), [#allocation8], 4294963200  ;;  %s2758_s20 = sld [smem:[#allocation29_spill]]  ;;  %s2445_s11 = scalar_lea.vmem [#allocation10], %s1474_s16 }
  0x96   : > { %s2759_s14 = sld [smem:[#allocation17_spill]] }
  0x9a   : > { %s1475_s22 = sshll.u32 %s2757_s17, 4 }
  0x9b   : > { %p484_p11 = scmp.lt.s32.totalorder %s1475_s22, 31 }
  0x9c   : > { %p1477_p13 = scmp.ne.s32.totalorder %s2759_s14, 0 }
  0x9d   : > { %s2796_s22 = smov (!%p484_p11, %s1475_s22), 31 }
  0x9e   : > { %s1476_s12 = sshll.u32 %s2796_s22, 3  ;;  %494 = sbr.rel (%p1477_p13) target bundleno = 172 (0xac), region = 101 }
  0x9f   : > { %s2443_s13 = scalar_lea.vmem %s2758_s20, %s1476_s12 }
  0xa3   : > { %v2167_v16 = vmov 0.0  }
  0xa4   : > { %495 = vst [vmem:[#allocation2 + $0x30] sm:$0xff] %v2167_v16  ;;  %496 = vst [vmem:[#allocation2] sm:$0xff] %v2167_v16 }
  0xa5   : > { %497 = vst [vmem:[#allocation2 + $0x58] sm:$0xff] %v2167_v16  ;;  %498 = vst [vmem:[#allocation2 + $0x18] sm:$0xff] %v2167_v16 }
  0xa6   : > { %499 = vst [vmem:[#allocation2 + $0x50] sm:$0xff] %v2167_v16  ;;  %500 = vst [vmem:[#allocation2 + $0x68] sm:$0xff] %v2167_v16 }
  0xa7   : > { %501 = vst [vmem:[#allocation2 + $0x8] sm:$0xff] %v2167_v16  ;;  %502 = vst [vmem:[#allocation2 + $0x48] sm:$0xff] %v2167_v16 }
  0xa8   : > { %503 = vst [vmem:[#allocation2 + $0x40] sm:$0xff] %v2167_v16  ;;  %504 = vst [vmem:[#allocation2 + $0x20] sm:$0xff] %v2167_v16 }
  0xa9   : > { %505 = vst [vmem:[#allocation2 + $0x10] sm:$0xff] %v2167_v16  ;;  %506 = vst [vmem:[#allocation2 + $0x38] sm:$0xff] %v2167_v16 }
  0xaa   : > { %507 = vst [vmem:[#allocation2 + $0x60] sm:$0xff] %v2167_v16  ;;  %508 = vst [vmem:[#allocation2 + $0x70] sm:$0xff] %v2167_v16 }
  0xab   : > { %509 = vst [vmem:[#allocation2 + $0x78] sm:$0xff] %v2167_v16  ;;  %510 = vst [vmem:[#allocation2 + $0x28] sm:$0xff] %v2167_v16 }
  0xac PF: > { %v1854_v17 = vld [vmem:[%s2417_s29 + $0x38] sm:$0xff]   ;;  %v1855_v18 = vld [vmem:[%s2417_s29 + $0x30] sm:$0xff]   ;;  %v1856_v19 = vld [vmem:[%s2417_s29 + $0x28] sm:$0xff]   ;;  %s2760_s10 = sld [smem:[#allocation17_spill]] }
  0xad   : > { %1640 = vmatprep.subr.bf16.mxu0 %v1854_v17  ;;  %1672 = vmatprep.subr.bf16.mxu1 %v1854_v17  ;;  %v1857_v20 = vld [vmem:[%s2417_s29 + $0x20] sm:$0xff]   ;;  %v1858_v23 = vld [vmem:[%s2417_s29 + $0x18] sm:$0xff]   ;;  %v1859_v24 = vld [vmem:[%s2417_s29 + $0x10] sm:$0xff]  }
  0xae   : > { %1641 = vmatpush3.bf16.msra.mxu0 %v1854_v17  ;;  %1680 = vmatpush3.bf16.msra.mxu1 %v1854_v17  ;;  %v1862_v21 = vld [vmem:[%s2415_s21] sm:$0xff]   ;;  %v1860_v25 = vld [vmem:[%s2417_s29 + $0x8] sm:$0xff]   ;;  %v1866_v29 = vld [vmem:[%s2415_s21 + $0x10] sm:$0xff]  }
  0xaf   : > { %1642 = vmatprep.subr.bf16.mxu0 %v1855_v18  ;;  %1673 = vmatprep.subr.bf16.mxu1 %v1855_v18  ;;  %v1863_v22 = vld [vmem:[%s2415_s21 + $0x20] sm:$0xff]   ;;  %v1864_v27 = vld [vmem:[%s2415_s21 + $0x8] sm:$0xff]   ;;  %v1867_v30 = vld [vmem:[%s2415_s21 + $0x30] sm:$0xff]  }
  0xb0   : > { %1656 = vmatprep.mubr.bf16.mxu0 %v1862_v21  ;;  %1664 = vmatprep.mubr.bf16.mxu1 %v1863_v22  ;;  %v1861_v26 = vld [vmem:[%s2417_s29] sm:$0xff]   ;;  %v1865_v28 = vld [vmem:[%s2415_s21 + $0x28] sm:$0xff]   ;;  %v1868_v31 = vld [vmem:[%s2415_s21 + $0x18] sm:$0xff]  }
  0xb1   : > { %v1869_v32 = vld [vmem:[%s2415_s21 + $0x38] sm:$0xff]   ;;  %v521_v34 = vld [vmem:[#allocation2 + $0x10] sm:$0xff]  ;;  %v519_v38 = vld [vmem:[#allocation2 + $0x40] sm:$0xff] }
  0xb2   : > { %1643 = vmatpush3.bf16.msra.mxu0 %v1855_v18  ;;  %1681 = vmatpush3.bf16.msra.mxu1 %v1855_v18  ;;  %v513_v33 = vld [vmem:[#allocation2 + $0x58] sm:$0xff]  ;;  %v511_v37 = vld [vmem:[#allocation2 + $0x30] sm:$0xff]  ;;  %v512_v49 = vld [vmem:[#allocation2] sm:$0xff]  ;;  %p1494_p4 = scmp.ne.s32.totalorder %s2760_s10, 1 }
  0xb3   : > { %1644 = vmatprep.subr.bf16.mxu0 %v1856_v19  ;;  %1674 = vmatprep.subr.bf16.mxu1 %v1856_v19  ;;  %v514_v43 = vld [vmem:[#allocation2 + $0x18] sm:$0xff]  ;;  %v520_v50 = vld [vmem:[#allocation2 + $0x20] sm:$0xff]  ;;  %v517_v55 = vld [vmem:[#allocation2 + $0x8] sm:$0xff]  ;;  %s2761_s21 = sld [smem:[#allocation31_spill]] (!%p1494_p4) }
  0xb4   : > { %v522_v44 = vld [vmem:[#allocation2 + $0x38] sm:$0xff]  ;;  %v515_v61 = vld [vmem:[#allocation2 + $0x50] sm:$0xff]  ;;  %v523_v62 = vld [vmem:[#allocation2 + $0x60] sm:$0xff] }
  0xb5   : > { %v525_v56 = vld [vmem:[#allocation2 + $0x78] sm:$0xff]  ;;  %v518_v3 = vld [vmem:[#allocation2 + $0x48] sm:$0xff]  ;;  %v524_v10 = vld [vmem:[#allocation2 + $0x70] sm:$0xff] }
  0xb6   : > { %1645 = vmatpush3.bf16.msra.mxu0 %v1856_v19  ;;  %1682 = vmatpush3.bf16.msra.mxu1 %v1856_v19  ;;  %v526_v4 = vld [vmem:[#allocation2 + $0x28] sm:$0xff] }
  0xb7   : > { %1646 = vmatprep.subr.bf16.mxu0 %v1857_v20  ;;  %1675 = vmatprep.subr.bf16.mxu1 %v1857_v20  ;;  %v516_v9 = vld [vmem:[#allocation2 + $0x68] sm:$0xff] }
  0xba   : > { %1647 = vmatpush3.bf16.msra.mxu0 %v1857_v20  ;;  %1683 = vmatpush3.bf16.msra.mxu1 %v1857_v20 }
  0xbb   : > { %1648 = vmatprep.subr.bf16.mxu0 %v1858_v23  ;;  %1676 = vmatprep.subr.bf16.mxu1 %v1858_v23 }
  0xbe   : > { %1649 = vmatpush3.bf16.msra.mxu0 %v1858_v23  ;;  %1684 = vmatpush3.bf16.msra.mxu1 %v1858_v23 }
  0xbf   : > { %1650 = vmatprep.subr.bf16.mxu0 %v1859_v24  ;;  %1677 = vmatprep.subr.bf16.mxu1 %v1859_v24 }
  0xc2   : > { %1651 = vmatpush3.bf16.msra.mxu0 %v1859_v24  ;;  %1685 = vmatpush3.bf16.msra.mxu1 %v1859_v24 }
  0xc3   : > { %1652 = vmatprep.subr.bf16.mxu0 %v1860_v25  ;;  %1678 = vmatprep.subr.bf16.mxu1 %v1860_v25 }
  0xc6   : > { %1653 = vmatpush3.bf16.msra.mxu0 %v1860_v25  ;;  %1686 = vmatpush3.bf16.msra.mxu1 %v1860_v25 }
  0xc7   : > { %1654 = vmatprep.subr.bf16.mxu0 %v1861_v26  ;;  %1679 = vmatprep.subr.bf16.mxu1 %v1861_v26 }
  0xca   : > { %1655 = vmatpush3.bf16.msra.mxu0 %v1861_v26  ;;  %1687 = vmatpush3.bf16.msra.mxu1 %v1861_v26 }
  0xcd   : > { %1657 = vmatmul.mubr.bf16.vlgmr.msra.gmra.mxu0 %v1864_v27  ;;  %1665 = vmatmul.mubr.bf16.vlgmr.msra.gmra.mxu1 %v1865_v28 }
  0xce   : > { %1660 = vmatprep.mubr.bf16.mxu0 %v1866_v29  ;;  %1668 = vmatprep.mubr.bf16.mxu1 %v1867_v30 }
  0xd5   : > { %1661 = vmatmul.mubr.bf16.gmra.mxu0 %v1868_v31  ;;  %1669 = vmatmul.mubr.bf16.gmra.mxu1 %v1869_v32 }
 0x18d   : > { %v1658_v35 = vpop.f32.mrf.mxu0  ;;  %v1666_v36 = vpop.f32.mrf.mxu1 }
 0x18e   : > { %v754_v39 = vadd.f32 %v1658_v35, %v513_v33  ;;  %v762_v40 = vadd.f32 %v1666_v36, %v521_v34 }
 0x18f   : > { %v689_v41 = vpop.f32.mrf.mxu0  ;;  %v721_v42 = vpop.f32.mrf.mxu1 }
 0x190   : > { %770 = vst [vmem:[#allocation2 + $0x58] sm:$0xff] %v754_v39  ;;  %778 = vst [vmem:[#allocation2 + $0x10] sm:$0xff] %v762_v40  ;;  %v752_v45 = vadd.f32 %v689_v41, %v511_v37  ;;  %v760_v46 = vadd.f32 %v721_v42, %v519_v38 }
 0x191   : > { %v1659_v47 = vpop.f32.mrf.mxu0  ;;  %v1667_v48 = vpop.f32.mrf.mxu1 }
 0x192   : > { %768 = vst [vmem:[#allocation2 + $0x30] sm:$0xff] %v752_v45  ;;  %776 = vst [vmem:[#allocation2 + $0x40] sm:$0xff] %v760_v46  ;;  %v755_v51 = vadd.f32 %v1659_v47, %v514_v43  ;;  %v763_v52 = vadd.f32 %v1667_v48, %v522_v44 }
 0x193   : > { %v692_v53 = vpop.f32.mrf.mxu0  ;;  %v724_v54 = vpop.f32.mrf.mxu1 }
 0x194   : > { %771 = vst [vmem:[#allocation2 + $0x18] sm:$0xff] %v755_v51  ;;  %779 = vst [vmem:[#allocation2 + $0x38] sm:$0xff] %v763_v52  ;;  %v753_v57 = vadd.f32 %v692_v53, %v512_v49  ;;  %v761_v58 = vadd.f32 %v724_v54, %v520_v50 }
 0x195   : > { %v1662_v59 = vpop.f32.mrf.mxu0  ;;  %v1670_v60 = vpop.f32.mrf.mxu1 }
 0x196   : > { %769 = vst [vmem:[#allocation2] sm:$0xff] %v753_v57  ;;  %777 = vst [vmem:[#allocation2 + $0x20] sm:$0xff] %v761_v58  ;;  %v758_v63 = vadd.f32 %v1662_v59, %v517_v55  ;;  %v766_v0 = vadd.f32 %v1670_v60, %v525_v56 }
 0x197   : > { %v705_v1 = vpop.f32.mrf.mxu0  ;;  %v737_v2 = vpop.f32.mrf.mxu1 }
 0x198   : > { %774 = vst [vmem:[#allocation2 + $0x8] sm:$0xff] %v758_v63  ;;  %782 = vst [vmem:[#allocation2 + $0x78] sm:$0xff] %v766_v0  ;;  %v756_v5 = vadd.f32 %v705_v1, %v515_v61  ;;  %v764_v6 = vadd.f32 %v737_v2, %v523_v62 }
 0x199   : > { %v1663_v7 = vpop.f32.mrf.mxu0  ;;  %v1671_v8 = vpop.f32.mrf.mxu1 }
 0x19a   : > { %772 = vst [vmem:[#allocation2 + $0x50] sm:$0xff] %v756_v5  ;;  %780 = vst [vmem:[#allocation2 + $0x60] sm:$0xff] %v764_v6  ;;  %v759_v11 = vadd.f32 %v1663_v7, %v518_v3  ;;  %v767_v12 = vadd.f32 %v1671_v8, %v526_v4  ;;  %787 = sbr.rel (%p1494_p4) target bundleno = 954 (0x3ba), region = 105 }
 0x19b   : > { %v708_v13 = vpop.f32.mrf.mxu0  ;;  %v740_v14 = vpop.f32.mrf.mxu1 }
 0x19c   : > { %775 = vst [vmem:[#allocation2 + $0x48] sm:$0xff] %v759_v11  ;;  %783 = vst [vmem:[#allocation2 + $0x28] sm:$0xff] %v767_v12  ;;  %v757_v15 = vadd.f32 %v708_v13, %v516_v9  ;;  %v765_v16 = vadd.f32 %v740_v14, %v524_v10 }
 0x19e   : > { %773 = vst [vmem:[#allocation2 + $0x68] sm:$0xff] %v757_v15  ;;  %781 = vst [vmem:[#allocation2 + $0x70] sm:$0xff] %v765_v16 }
 0x19f   : > { %v805_v17 = vld [vmem:[%s2443_s13 + $0x8] sm:$0xff]  ;;  %v804_v18 = vld [vmem:[%s2443_s13] sm:$0xff]  ;;  %v2168_v20 = vmov 0   ;;  %v814_v26 = vld [vmem:[%s2443_s13 + $0x50] sm:$0xff] }
 0x1a0   : > { %v813_v19 = vld [vmem:[%s2443_s13 + $0x48] sm:$0xff]  ;;  %1871 = vset.pattern.permute.xlu1 %v2168_v20  ;;  %1870 = vset.pattern.permute.xlu0 %v2168_v20  ;;  %v821_v21 = vmax.f32 %v805_v17, 1.0  ;;  %v820_v22 = vmax.f32 %v804_v18, 1.0  ;;  %v812_v23 = vld [vmem:[%s2443_s13 + $0x40] sm:$0xff]  ;;  %v806_v27 = vld [vmem:[%s2443_s13 + $0x10] sm:$0xff]  ;;  %v830_v31 = vmax.f32 %v814_v26, 1.0 }
 0x1a1   : > { %v829_v24 = vmax.f32 %v813_v19, 1.0  ;;  %v828_v25 = vmax.f32 %v812_v23, 1.0  ;;  %v1011_v28 = vld [vmem:[#allocation9 + $0xf8] sm:$0xff]  ;;  %v1010_v30 = vld [vmem:[#allocation9 + $0xf0] sm:$0xff]  ;;  %v822_v32 = vmax.f32 %v806_v27, 1.0  ;;  %v1009_v36 = vld [vmem:[#allocation9 + $0xe8] sm:$0xff] }
 0x1a2   : > { %843 = vperm.xlu1 %1871, %v821_v21   ;;  %838 = vperm.xlu0 %1870, %v820_v22   ;;  %v995_v29 = vld [vmem:[#allocation9 + $0x78] sm:$0xff]  ;;  %v994_v33 = vld [vmem:[#allocation9 + $0x70] sm:$0xff]  ;;  %v993_v37 = vld [vmem:[#allocation9 + $0x68] sm:$0xff] }
 0x1a3   : > { %1560 = vmatprep.subr.mxu0 %v1011_v28  ;;  %1688 = vmatprep.subr.mxu1 %v1011_v28  ;;  %v815_v34 = vld [vmem:[%s2443_s13 + $0x58] sm:$0xff]  ;;  %v1008_v40 = vld [vmem:[#allocation9 + $0xe0] sm:$0xff]  ;;  %v817_v48 = vld [vmem:[%s2443_s13 + $0x68] sm:$0xff] }
 0x1a4   : > { %v807_v35 = vld [vmem:[%s2443_s13 + $0x18] sm:$0xff]  ;;  %1561 = vmatpush3.msra.mxu0 %v995_v29  ;;  %1704 = vmatpush3.msra.mxu1 %v995_v29  ;;  %v831_v38 = vmax.f32 %v815_v34, 1.0  ;;  %v816_v41 = vld [vmem:[%s2443_s13 + $0x60] sm:$0xff]  ;;  %v809_v49 = vld [vmem:[%s2443_s13 + $0x28] sm:$0xff]  ;;  %v833_v52 = vmax.f32 %v817_v48, 1.0 }
 0x1a5   : > { %1562 = vmatprep.subr.mxu0 %v1010_v30  ;;  %1689 = vmatprep.subr.mxu1 %v1010_v30  ;;  %v823_v39 = vmax.f32 %v807_v35, 1.0  ;;  %v808_v42 = vld [vmem:[%s2443_s13 + $0x20] sm:$0xff]  ;;  %v1007_v44 = vld [vmem:[#allocation9 + $0xd8] sm:$0xff]  ;;  %v832_v45 = vmax.f32 %v816_v41, 1.0  ;;  %v1006_v50 = vld [vmem:[#allocation9 + $0xd0] sm:$0xff]  ;;  %v825_v53 = vmax.f32 %v809_v49, 1.0 }
 0x1a6   : > { %883 = vperm.xlu1 %1871, %v829_v24   ;;  %878 = vperm.xlu0 %1870, %v828_v25   ;;  %v992_v43 = vld [vmem:[#allocation9 + $0x60] sm:$0xff]  ;;  %v824_v46 = vmax.f32 %v808_v42, 1.0  ;;  %v991_v47 = vld [vmem:[#allocation9 + $0x58] sm:$0xff]  ;;  %v990_v51 = vld [vmem:[#allocation9 + $0x50] sm:$0xff] }
 0x1a7   : > { %1563 = vmatpush3.msra.mxu0 %v994_v33  ;;  %1705 = vmatpush3.msra.mxu1 %v994_v33  ;;  %v1005_v54 = vld [vmem:[#allocation9 + $0xc8] sm:$0xff]  ;;  %v818_v55 = vld [vmem:[%s2443_s13 + $0x70] sm:$0xff]  ;;  %v1004_v58 = vld [vmem:[#allocation9 + $0xc0] sm:$0xff] }
 0x1a8   : > { %1564 = vmatprep.subr.mxu0 %v1009_v36  ;;  %1690 = vmatprep.subr.mxu1 %v1009_v36  ;;  %v810_v56 = vld [vmem:[%s2443_s13 + $0x30] sm:$0xff]  ;;  %v989_v57 = vld [vmem:[#allocation9 + $0x48] sm:$0xff]  ;;  %v834_v59 = vmax.f32 %v818_v55, 1.0  ;;  %v988_v61 = vld [vmem:[#allocation9 + $0x40] sm:$0xff] }
 0x1a9   : > { %1565 = vmatpush3.msra.mxu0 %v993_v37  ;;  %1706 = vmatpush3.msra.mxu1 %v993_v37  ;;  %v826_v60 = vmax.f32 %v810_v56, 1.0  ;;  %v819_v62 = vld [vmem:[%s2443_s13 + $0x78] sm:$0xff]  ;;  %v1002_v4 = vld [vmem:[#allocation9 + $0xb0] sm:$0xff]  ;;  %v1001_v6 = vld [vmem:[#allocation9 + $0xa8] sm:$0xff] }
 0x1aa   : > { %888 = vperm.xlu1 %1871, %v830_v31   ;;  %848 = vperm.xlu0 %1870, %v822_v32   ;;  %v811_v63 = vld [vmem:[%s2443_s13 + $0x38] sm:$0xff]  ;;  %v835_v2 = vmax.f32 %v819_v62, 1.0  ;;  %v986_v5 = vld [vmem:[#allocation9 + $0x30] sm:$0xff]  ;;  %v985_v7 = vld [vmem:[#allocation9 + $0x28] sm:$0xff] }
 0x1ab   : > { %1566 = vmatprep.subr.mxu0 %v1008_v40  ;;  %1691 = vmatprep.subr.mxu1 %v1008_v40  ;;  %v1003_v0 = vld [vmem:[#allocation9 + $0xb8] sm:$0xff]  ;;  %v827_v3 = vmax.f32 %v811_v63, 1.0  ;;  %v1000_v8 = vld [vmem:[#allocation9 + $0xa0] sm:$0xff]  ;;  %v998_v13 = vld [vmem:[#allocation9 + $0x90] sm:$0xff] }
 0x1ac   : > { %1567 = vmatpush3.msra.mxu0 %v992_v43  ;;  %1707 = vmatpush3.msra.mxu1 %v992_v43  ;;  %v987_v1 = vld [vmem:[#allocation9 + $0x38] sm:$0xff]  ;;  %v984_v9 = vld [vmem:[#allocation9 + $0x20] sm:$0xff]  ;;  %v982_v14 = vld [vmem:[#allocation9 + $0x10] sm:$0xff] }
 0x1ad   : > { %1568 = vmatprep.subr.mxu0 %v1007_v44  ;;  %1692 = vmatprep.subr.mxu1 %v1007_v44  ;;  %v999_v10 = vld [vmem:[#allocation9 + $0x98] sm:$0xff]  ;;  %v2482_v11 = vld [vmem:[%s2428_s30] sm:$0xff]   ;;  %v997_v16 = vld [vmem:[#allocation9 + $0x88] sm:$0xff] }
 0x1ae   : > { %893 = vperm.xlu1 %1871, %v831_v38   ;;  %853 = vperm.xlu0 %1870, %v823_v39   ;;  %v983_v12 = vld [vmem:[#allocation9 + $0x18] sm:$0xff]  ;;  %v1507_v15 = vunpack.c.l.bf16 %v2482_v11  ;;  %v2486_v17 = vld [vmem:[%s2428_s30 + $0x20] sm:$0xff]   ;;  %v981_v18 = vld [vmem:[#allocation9 + $0x8] sm:$0xff]  ;;  %v1508_v33 = vunpack.c.h.bf16 %v2482_v11 }
 0x1af   : > { %1569 = vmatpush3.msra.mxu0 %v991_v47  ;;  %1708 = vmatpush3.msra.mxu1 %v991_v47  ;;  %v996_v19 = vld [vmem:[#allocation9 + $0x80] sm:$0xff]  ;;  %v1523_v21 = vunpack.c.l.bf16 %v2486_v17  ;;  %v788_v30 = vld [vmem:[#allocation2 + $0x30] sm:$0xff]  ;;  %v1537_v38 = vld [vmem:[%s2428_s30 + $0x8] sm:$0xff]   ;;  %v1524_v42 = vunpack.c.h.bf16 %v2486_v17 }
 0x1b0   : > { %1570 = vmatprep.subr.mxu0 %v1006_v50  ;;  %1693 = vmatprep.subr.mxu1 %v1006_v50  ;;  %v980_v20 = vld [vmem:[#allocation9] sm:$0xff]  ;;  %v1511_v43 = vunpack.c.l.bf16 %v1537_v38  ;;  %v1541_v47 = vld [vmem:[%s2428_s30 + $0x28] sm:$0xff]   ;;  %v790_v49 = vld [vmem:[#allocation2 + $0x58] sm:$0xff] }
 0x1b1   : > { %1571 = vmatpush3.msra.mxu0 %v990_v51  ;;  %1709 = vmatpush3.msra.mxu1 %v990_v51  ;;  %v789_v34 = vld [vmem:[#allocation2] sm:$0xff] }
 0x1b2   : > { %898 = vperm.xlu1 %1871, %v832_v45   ;;  %858 = vperm.xlu0 %1870, %v824_v46   ;;  %v796_v39 = vld [vmem:[#allocation2 + $0x40] sm:$0xff] }
 0x1b3   : > { %1572 = vmatprep.subr.mxu0 %v1005_v54  ;;  %1694 = vmatprep.subr.mxu1 %v1005_v54  ;;  %v797_v50 = vld [vmem:[#allocation2 + $0x20] sm:$0xff] }
 0x1b4   : > { %1573 = vmatpush3.msra.mxu0 %v989_v57  ;;  %1710 = vmatpush3.msra.mxu1 %v989_v57  ;;  %v800_v17 = vld [vmem:[#allocation2 + $0x60] sm:$0xff] }
 0x1b5   : > { %1574 = vmatprep.subr.mxu0 %v1004_v58  ;;  %1695 = vmatprep.subr.mxu1 %v1004_v58  ;;  %v1538_v58 = vld [vmem:[%s2428_s30 + $0x10] sm:$0xff]  }
 0x1b6   : > { %903 = vperm.xlu1 %1871, %v833_v52   ;;  %863 = vperm.xlu0 %1870, %v825_v53   ;;  %v1512_v52 = vunpack.c.h.bf16 %v1537_v38  ;;  %v1527_v53 = vunpack.c.l.bf16 %v1541_v47  ;;  %v1515_v63 = vunpack.c.l.bf16 %v1538_v58 }
 0x1b7   : > { %1575 = vmatpush3.msra.mxu0 %v988_v61  ;;  %1711 = vmatpush3.msra.mxu1 %v988_v61  ;;  %v798_v61 = vld [vmem:[#allocation2 + $0x10] sm:$0xff] }
 0x1b8   : > { %1576 = vmatprep.subr.mxu0 %v1003_v0  ;;  %1696 = vmatprep.subr.mxu1 %v1003_v0  ;;  %v1528_v0 = vunpack.c.h.bf16 %v1541_v47 }
 0x1b9   : > { %1577 = vmatpush3.msra.mxu0 %v987_v1  ;;  %1712 = vmatpush3.msra.mxu1 %v987_v1 }
 0x1ba   : > { %908 = vperm.xlu1 %1871, %v834_v59   ;;  %868 = vperm.xlu0 %1870, %v826_v60   ;;  %v791_v60 = vld [vmem:[#allocation2 + $0x18] sm:$0xff] }
 0x1bb   : > { %1578 = vmatprep.subr.mxu0 %v1002_v4  ;;  %1697 = vmatprep.subr.mxu1 %v1002_v4  ;;  %v1542_v4 = vld [vmem:[%s2428_s30 + $0x30] sm:$0xff]  }
 0x1bc   : > { %1579 = vmatpush3.msra.mxu0 %v986_v5  ;;  %1713 = vmatpush3.msra.mxu1 %v986_v5  ;;  %v1531_v11 = vunpack.c.l.bf16 %v1542_v4 }
 0x1bd   : > { %1580 = vmatprep.subr.mxu0 %v1001_v6  ;;  %1698 = vmatprep.subr.mxu1 %v1001_v6 }
 0x1be   : > { %913 = vperm.xlu1 %1871, %v835_v2   ;;  %873 = vperm.xlu0 %1870, %v827_v3  }
 0x1bf   : > { %1581 = vmatpush3.msra.mxu0 %v985_v7  ;;  %1714 = vmatpush3.msra.mxu1 %v985_v7  ;;  %v792_v7 = vld [vmem:[#allocation2 + $0x50] sm:$0xff] }
 0x1c0   : > { %1582 = vmatprep.subr.mxu0 %v1000_v8  ;;  %1699 = vmatprep.subr.mxu1 %v1000_v8  ;;  %v799_v8 = vld [vmem:[#allocation2 + $0x38] sm:$0xff] }
 0x1c1   : > { %1583 = vmatpush3.msra.mxu0 %v984_v9  ;;  %1715 = vmatpush3.msra.mxu1 %v984_v9 }
 0x1c2   : > { %1584 = vmatprep.subr.mxu0 %v999_v10  ;;  %1700 = vmatprep.subr.mxu1 %v999_v10  ;;  %v1516_v10 = vunpack.c.h.bf16 %v1538_v58 }
 0x1c3   : > { %1585 = vmatpush3.msra.mxu0 %v983_v12  ;;  %1716 = vmatpush3.msra.mxu1 %v983_v12 }
 0x1c4   : > { %1586 = vmatprep.subr.mxu0 %v998_v13  ;;  %1701 = vmatprep.subr.mxu1 %v998_v13 }
 0x1c5   : > { %1587 = vmatpush3.msra.mxu0 %v982_v14  ;;  %1717 = vmatpush3.msra.mxu1 %v982_v14  ;;  %v1539_v14 = vld [vmem:[%s2428_s30 + $0x18] sm:$0xff]  }
 0x1c6   : > { %1588 = vmatprep.subr.mxu0 %v997_v16  ;;  %1083 = vmatprep.mubr.f32.mxu0 %v1507_v15 }
 0x1c7   : > { %1589 = vmatpush3.msra.mxu0 %v981_v18  ;;  %1702 = vmatprep.subr.mxu1 %v997_v16  ;;  %v793_v16 = vld [vmem:[#allocation2 + $0x68] sm:$0xff] }
 0x1c8   : > { %1590 = vmatprep.subr.mxu0 %v996_v19  ;;  %1718 = vmatpush3.msra.mxu1 %v981_v18 }
 0x1c9   : > { %1591 = vmatpush3.msra.mxu0 %v980_v20  ;;  %1703 = vmatprep.subr.mxu1 %v996_v19  ;;  %v1519_v19 = vunpack.c.l.bf16 %v1539_v14 }
 0x1ca   : > { %1719 = vmatpush3.msra.mxu1 %v980_v20  ;;  %1123 = vmatprep.mubr.f32.mxu1 %v1523_v21  ;;  %v1532_v20 = vunpack.c.h.bf16 %v1542_v4 }
 0x21d   : > { %v844_v22 = vpop.permute.xlu1 %843  ;;  %v839_v23 = vpop.permute.xlu0 %838 }
 0x21e   : > { %1872 = vrcp.f32 %v844_v22 }
 0x21f   : > { %1874 = vrcp.f32 %v839_v23  ;;  %v1543_v23 = vld [vmem:[%s2428_s30 + $0x38] sm:$0xff]  }
 0x221   : > { %v884_v24 = vpop.permute.xlu1 %883  ;;  %v879_v25 = vpop.permute.xlu0 %878 }
 0x222   : > { %1876 = vrcp.f32 %v879_v25  ;;  %v794_v25 = vld [vmem:[#allocation2 + $0x8] sm:$0xff] }
 0x223   : > { %1878 = vrcp.f32 %v884_v24 }
 0x225   : > { %v889_v26 = vpop.permute.xlu1 %888  ;;  %v849_v27 = vpop.permute.xlu0 %848 }
 0x226   : > { %1880 = vrcp.f32 %v849_v27 }
 0x227   : > { %1882 = vrcp.f32 %v889_v26  ;;  %v801_v26 = vld [vmem:[#allocation2 + $0x70] sm:$0xff] }
 0x229   : > { %v894_v28 = vpop.permute.xlu1 %893  ;;  %v854_v29 = vpop.permute.xlu0 %853 }
 0x22a   : > { %1884 = vrcp.f32 %v854_v29  ;;  %v1535_v29 = vunpack.c.l.bf16 %v1543_v23 }
 0x22b   : > { %v1873_v31 = vpop.eup %1872  ;;  %1886 = vrcp.f32 %v894_v28  ;;  %v1520_v28 = vunpack.c.h.bf16 %v1539_v14 }
 0x22c   : > { %v1875_v32 = vpop.eup %1874  ;;  %v919_v40 = vmul.f32 %v1873_v31, %v789_v34  ;;  %v802_v34 = vld [vmem:[#allocation2 + $0x78] sm:$0xff] }
 0x22d   : > { %v899_v35 = vpop.permute.xlu1 %898  ;;  %v859_v36 = vpop.permute.xlu0 %858  ;;  %v917_v37 = vmul.f32 %v1875_v32, %v788_v30 }
 0x22e   : > { %1888 = vrcp.f32 %v859_v36  ;;  %v1536_v36 = vunpack.c.h.bf16 %v1543_v23 }
 0x22f   : > { %1084 = vmatmul.mubr.f32.vlgmr.msra.gmra.mxu0 %v917_v37  ;;  %v1877_v41 = vpop.eup %1876  ;;  %1890 = vrcp.f32 %v899_v35 }
 0x230   : > { %1088 = vmatprep.mubr.f32.mxu0 %v1508_v33  ;;  %v933_v46 = vmul.f32 %v1877_v41, %v796_v39  ;;  %v1879_v48 = vpop.eup %1878  ;;  %v795_v33 = vld [vmem:[#allocation2 + $0x48] sm:$0xff] }
 0x231   : > { %v904_v44 = vpop.permute.xlu1 %903  ;;  %v864_v45 = vpop.permute.xlu0 %863  ;;  %v935_v57 = vmul.f32 %v1879_v48, %v797_v50 }
 0x232   : > { %1892 = vrcp.f32 %v864_v45  ;;  %1124 = vmatmul.mubr.f32.vlgmr.msra.gmra.mxu1 %v933_v46 }
 0x233   : > { %1089 = vmatmul.mubr.f32.gmra.mxu0 %v919_v40  ;;  %v1881_v51 = vpop.eup %1880  ;;  %1128 = vmatprep.mubr.f32.mxu1 %v1524_v42  ;;  %1894 = vrcp.f32 %v904_v44  ;;  %v803_v40 = vld [vmem:[#allocation2 + $0x28] sm:$0xff] }
 0x234   : > { %1093 = vmatprep.mubr.f32.mxu0 %v1511_v43  ;;  %v921_v56 = vmul.f32 %v1881_v51, %v790_v49  ;;  %v1883_v59 = vpop.eup %1882  ;;  %v2500_v43 = vld [vmem:[%s2761_s21] ss:$0 sm:$0xff] }
 0x235   : > { %v909_v54 = vpop.permute.xlu1 %908  ;;  %v869_v55 = vpop.permute.xlu0 %868  ;;  %v937_v3 = vmul.f32 %v1883_v59, %v798_v61 }
 0x236   : > { %1896 = vrcp.f32 %v869_v55  ;;  %1129 = vmatmul.mubr.f32.gmra.mxu1 %v935_v57 }
 0x237   : > { %1094 = vmatmul.mubr.f32.gmra.mxu0 %v921_v56  ;;  %v1885_v62 = vpop.eup %1884  ;;  %1133 = vmatprep.mubr.f32.mxu1 %v1527_v53  ;;  %1898 = vrcp.f32 %v909_v54 }
 0x238   : > { %1098 = vmatprep.mubr.f32.mxu0 %v1512_v52  ;;  %v923_v2 = vmul.f32 %v1885_v62, %v791_v60  ;;  %v1887_v5 = vpop.eup %1886 }
 0x239   : > { %v874_v1 = vpop.permute.xlu0 %873  ;;  %v914_v6 = vpop.permute.xlu1 %913  ;;  %v939_v13 = vmul.f32 %v1887_v5, %v799_v8 }
 0x23a   : > { %1900 = vrcp.f32 %v874_v1  ;;  %1134 = vmatmul.mubr.f32.gmra.mxu1 %v937_v3 }
 0x23b   : > { %1099 = vmatmul.mubr.f32.gmra.mxu0 %v923_v2  ;;  %v1889_v9 = vpop.eup %1888  ;;  %1138 = vmatprep.mubr.f32.mxu1 %v1528_v0  ;;  %1902 = vrcp.f32 %v914_v6 }
 0x23c   : > { %1103 = vmatprep.mubr.f32.mxu0 %v1515_v63  ;;  %v925_v12 = vmul.f32 %v1889_v9, %v792_v7  ;;  %v1891_v15 = vpop.eup %1890 }
 0x23d   : > { %v941_v22 = vmul.f32 %v1891_v15, %v800_v17 }
 0x23e   : > { %1139 = vmatmul.mubr.f32.gmra.mxu1 %v939_v13 }
 0x23f   : > { %1104 = vmatmul.mubr.f32.gmra.mxu0 %v925_v12  ;;  %v1893_v18 = vpop.eup %1892  ;;  %1143 = vmatprep.mubr.f32.mxu1 %v1531_v11 }
 0x240   : > { %1108 = vmatprep.mubr.f32.mxu0 %v1516_v10  ;;  %v927_v21 = vmul.f32 %v1893_v18, %v793_v16  ;;  %v1895_v24 = vpop.eup %1894 }
 0x241   : > { %v943_v31 = vmul.f32 %v1895_v24, %v801_v26 }
 0x242   : > { %1144 = vmatmul.mubr.f32.gmra.mxu1 %v941_v22 }
 0x243   : > { %1109 = vmatmul.mubr.f32.gmra.mxu0 %v927_v21  ;;  %v1897_v27 = vpop.eup %1896  ;;  %1148 = vmatprep.mubr.f32.mxu1 %v1532_v20 }
 0x244   : > { %1113 = vmatprep.mubr.f32.mxu0 %v1519_v19  ;;  %v929_v30 = vmul.f32 %v1897_v27, %v794_v25  ;;  %v1899_v32 = vpop.eup %1898 }
 0x245   : > { %v945_v38 = vmul.f32 %v1899_v32, %v802_v34 }
 0x246   : > { %1149 = vmatmul.mubr.f32.gmra.mxu1 %v943_v31 }
 0x247   : > { %1114 = vmatmul.mubr.f32.gmra.mxu0 %v929_v30  ;;  %v1901_v35 = vpop.eup %1900  ;;  %1153 = vmatprep.mubr.f32.mxu1 %v1535_v29 }
 0x248   : > { %1118 = vmatprep.mubr.f32.mxu0 %v1520_v28  ;;  %v931_v37 = vmul.f32 %v1901_v35, %v795_v33  ;;  %v1903_v39 = vpop.eup %1902 }
 0x249   : > { %v947_v41 = vmul.f32 %v1903_v39, %v803_v40 }
 0x24a   : > { %1154 = vmatmul.mubr.f32.gmra.mxu1 %v945_v38 }
 0x24b   : > { %1119 = vmatmul.mubr.f32.gmra.mxu0 %v931_v37  ;;  %1158 = vmatprep.mubr.f32.mxu1 %v1536_v36 }
 0x24e   : > { %1159 = vmatmul.mubr.f32.gmra.mxu1 %v947_v41 }
 0x2ef   : > { %v1592_v42 = vpop.f32.mrf.mxu0 }
 0x2f1   : > { %v1593_v44 = vpop.f32.mrf.mxu0 }
 0x2f2   : > { %v1594_v45 = vadd.f32 %v1593_v44, %v1592_v42  ;;  %v1616_v47 = vpop.f32.mrf.mxu1 }
 0x2f3   : > { %v1595_v46 = vpop.f32.mrf.mxu0 }
 0x2f4   : > { %v2503_v48 = vadd.f32 %v1594_v45, %v2500_v43  ;;  %v1617_v50 = vpop.f32.mrf.mxu1 }
 0x2f5   : > { %v1596_v49 = vpop.f32.mrf.mxu0  ;;  %v1618_v52 = vadd.f32 %v1617_v50, %v1616_v47 }
 0x2f6   : > { %v1597_v51 = vadd.f32 %v1596_v49, %v1595_v46  ;;  %v1164_v53 = vmul.f32 %v2503_v48, %v2503_v48  ;;  %v1619_v55 = vpop.f32.mrf.mxu1 }
 0x2f7   : > { %v1598_v54 = vpop.f32.mrf.mxu0  ;;  %v2508_v56 = vadd.f32 %v1618_v52, %v2500_v43 }
 0x2f8   : > { %1180 = vadd.xlane.f32.xlu0 %v1164_v53  ;;  %v2511_v57 = vadd.f32 %v1597_v51, %v2500_v43  ;;  %v1620_v59 = vpop.f32.mrf.mxu1 }
 0x2f9   : > { %v1599_v58 = vpop.f32.mrf.mxu0  ;;  %v1621_v61 = vadd.f32 %v1620_v59, %v1619_v55  ;;  %v1172_v62 = vmul.f32 %v2508_v56, %v2508_v56 }
 0x2fa   : > { %v1600_v60 = vadd.f32 %v1599_v58, %v1598_v54  ;;  %v1622_v0 = vpop.f32.mrf.mxu1  ;;  %v1165_v4 = vmul.f32 %v2511_v57, %v2511_v57 }
 0x2fb   : > { %v1601_v63 = vpop.f32.mrf.mxu0  ;;  %v2516_v1 = vadd.f32 %v1621_v61, %v2500_v43  ;;  %1196 = vadd.xlane.f32.xlu1 %v1172_v62 }
 0x2fc   : > { %v1623_v3 = vpop.f32.mrf.mxu1  ;;  %v2521_v5 = vadd.f32 %v1600_v60, %v2500_v43 }
 0x2fd   : > { %v1602_v2 = vpop.f32.mrf.mxu0  ;;  %v1624_v7 = vadd.f32 %v1623_v3, %v1622_v0  ;;  %v1173_v8 = vmul.f32 %v2516_v1, %v2516_v1 }
 0x2fe   : > { %v1603_v6 = vadd.f32 %v1602_v2, %v1601_v63  ;;  %v1625_v10 = vpop.f32.mrf.mxu1  ;;  %v1166_v18 = vmul.f32 %v2521_v5, %v2521_v5 }
 0x2ff   : > { %v1604_v9 = vpop.f32.mrf.mxu0  ;;  %v2526_v11 = vadd.f32 %v1624_v7, %v2500_v43  ;;  %1182 = vadd.xlane.f32.xlu1 %v1165_v4  ;;  %1198 = vadd.xlane.f32.xlu0 %v1173_v8 }
 0x300   : > { %v2529_v12 = vadd.f32 %v1603_v6, %v2500_v43  ;;  %v1626_v14 = vpop.f32.mrf.mxu1 }
 0x301   : > { %v1605_v13 = vpop.f32.mrf.mxu0  ;;  %v1627_v16 = vadd.f32 %v1626_v14, %v1625_v10  ;;  %v1174_v17 = vmul.f32 %v2526_v11, %v2526_v11 }
 0x302   : > { %v1606_v15 = vadd.f32 %v1605_v13, %v1604_v9  ;;  %v1628_v20 = vpop.f32.mrf.mxu1  ;;  %v1167_v24 = vmul.f32 %v2529_v12, %v2529_v12 }
 0x303   : > { %v1607_v19 = vpop.f32.mrf.mxu0  ;;  %1200 = vadd.xlane.f32.xlu1 %v1174_v17  ;;  %1184 = vadd.xlane.f32.xlu0 %v1166_v18  ;;  %v2541_v25 = vadd.f32 %v1627_v16, %v2500_v43 }
 0x304   : > { %v2536_v21 = vadd.f32 %v1606_v15, %v2500_v43  ;;  %v1629_v23 = vpop.f32.mrf.mxu1 }
 0x305   : > { %v1608_v22 = vpop.f32.mrf.mxu0  ;;  %v1630_v27 = vadd.f32 %v1629_v23, %v1628_v20  ;;  %v1175_v38 = vmul.f32 %v2541_v25, %v2541_v25 }
 0x306   : > { %v1609_v26 = vadd.f32 %v1608_v22, %v1607_v19  ;;  %v1168_v28 = vmul.f32 %v2536_v21, %v2536_v21  ;;  %v1631_v30 = vpop.f32.mrf.mxu1 }
 0x307   : > { %v1610_v29 = vpop.f32.mrf.mxu0  ;;  %v2546_v31 = vadd.f32 %v1630_v27, %v2500_v43  ;;  %1186 = vadd.xlane.f32.xlu0 %v1167_v24 }
 0x308   : > { %1188 = vadd.xlane.f32.xlu1 %v1168_v28  ;;  %v2549_v32 = vadd.f32 %v1609_v26, %v2500_v43  ;;  %v1632_v34 = vpop.f32.mrf.mxu1 }
 0x309   : > { %v1611_v33 = vpop.f32.mrf.mxu0  ;;  %v1633_v36 = vadd.f32 %v1632_v34, %v1631_v30  ;;  %v1176_v37 = vmul.f32 %v2546_v31, %v2546_v31 }
 0x30a   : > { %v1612_v35 = vadd.f32 %v1611_v33, %v1610_v29  ;;  %v1634_v40 = vpop.f32.mrf.mxu1  ;;  %v1169_v45 = vmul.f32 %v2549_v32, %v2549_v32 }
 0x30b   : > { %v1613_v39 = vpop.f32.mrf.mxu0  ;;  %1202 = vadd.xlane.f32.xlu0 %v1175_v38  ;;  %v2561_v46 = vadd.f32 %v1633_v36, %v2500_v43 }
 0x30c   : > { %v2556_v41 = vadd.f32 %v1612_v35, %v2500_v43  ;;  %1204 = vadd.xlane.f32.xlu1 %v1176_v37  ;;  %v1635_v44 = vpop.f32.mrf.mxu1 }
 0x30d   : > { %v1614_v42 = vpop.f32.mrf.mxu0  ;;  %v1636_v49 = vadd.f32 %v1635_v44, %v1634_v40  ;;  %v1177_v59 = vmul.f32 %v2561_v46, %v2561_v46 }
 0x30e   : > { %v1615_v47 = vadd.f32 %v1614_v42, %v1613_v39  ;;  %v1170_v50 = vmul.f32 %v2556_v41, %v2556_v41  ;;  %v1637_v51 = vpop.f32.mrf.mxu1 }
 0x30f   : > { %v2566_v52 = vadd.f32 %v1636_v49, %v2500_v43  ;;  %1190 = vadd.xlane.f32.xlu0 %v1169_v45 }
 0x310   : > { %1192 = vadd.xlane.f32.xlu1 %v1170_v50  ;;  %v1638_v53 = vpop.f32.mrf.mxu1  ;;  %v2569_v54 = vadd.f32 %v1615_v47, %v2500_v43 }
 0x311   : > { %v1639_v55 = vadd.f32 %v1638_v53, %v1637_v51  ;;  %v1178_v58 = vmul.f32 %v2566_v52, %v2566_v52 }
 0x312   : > { %v1171_v61 = vmul.f32 %v2569_v54, %v2569_v54 }
 0x313   : > { %1206 = vadd.xlane.f32.xlu0 %v1177_v59  ;;  %v2576_v60 = vadd.f32 %v1639_v55, %v2500_v43 }
 0x314   : > { %1208 = vadd.xlane.f32.xlu1 %v1178_v58 }
 0x315   : > { %v1179_v62 = vmul.f32 %v2576_v60, %v2576_v60 }
 0x317   : > { %1194 = vadd.xlane.f32.xlu0 %v1171_v61 }
 0x31b   : > { %1210 = vadd.xlane.f32.xlu0 %v1179_v62 }
 0x381   : > { %v1181_v63 = vpop.xlane.xlu0 %1180 }
 0x382   : > { %v1212_v0 = vmax.f32 %v1181_v63, 1e-24 }
 0x384   : > { %1904 = vrsqrt.f32 %v1212_v0  ;;  %v1197_v2 = vpop.xlane.xlu1 %1196 }
 0x385   : > { %v1220_v3 = vmax.f32 %v1197_v2, 1e-24 }
 0x387   : > { %1906 = vrsqrt.f32 %v1220_v3 }
 0x388   : > { %v1183_v4 = vpop.xlane.xlu1 %1182  ;;  %v1199_v6 = vpop.xlane.xlu0 %1198 }
 0x389   : > { %v1213_v7 = vmax.f32 %v1183_v4, 1e-24  ;;  %v1221_v8 = vmax.f32 %v1199_v6, 1e-24 }
 0x38b   : > { %1908 = vrsqrt.f32 %v1213_v7 }
 0x38c   : > { %1910 = vrsqrt.f32 %v1221_v8  ;;  %v1201_v43 = vpop.xlane.xlu1 %1200  ;;  %v1185_v9 = vpop.xlane.xlu0 %1184 }
 0x38d   : > { %v1222_v10 = vmax.f32 %v1201_v43, 1e-24  ;;  %v1214_v13 = vmax.f32 %v1185_v9, 1e-24 }
 0x38f   : > { %1912 = vrsqrt.f32 %v1222_v10 }
 0x390   : > { %1914 = vrsqrt.f32 %v1214_v13  ;;  %v1187_v16 = vpop.xlane.xlu0 %1186 }
 0x391   : > { %v1905_v14 = vpop.eup %1904  ;;  %v1189_v15 = vpop.xlane.xlu1 %1188  ;;  %v1215_v19 = vmax.f32 %v1187_v16, 1e-24 }
 0x392   : > { %v1244_v17 = vmul.f32 %v1905_v14, %v2503_v48  ;;  %v1216_v18 = vmax.f32 %v1189_v15, 1e-24 }
 0x394   : > { %v1260_v20 = vmax.f32 %v1244_v17, 0.0  ;;  %1916 = vrsqrt.f32 %v1216_v18  ;;  %v1907_v22 = vpop.eup %1906  ;;  %v1203_v24 = vpop.xlane.xlu0 %1202 }
 0x395   : > { %1918 = vrsqrt.f32 %v1215_v19  ;;  %v1205_v23 = vpop.xlane.xlu1 %1204  ;;  %v1252_v26 = vmul.f32 %v1907_v22, %v2508_v56  ;;  %v1223_v28 = vmax.f32 %v1203_v24, 1e-24 }
 0x396   : > { %1276 = vst [vmem:[%s2445_s11] sm:$0xff] %v1260_v20  ;;  %v1224_v27 = vmax.f32 %v1205_v23, 1e-24 }
 0x397   : > { %v1268_v29 = vmax.f32 %v1252_v26, 0.0 }
 0x398   : > { %1920 = vrsqrt.f32 %v1224_v27  ;;  %v1909_v30 = vpop.eup %1908  ;;  %v1191_v48 = vpop.xlane.xlu0 %1190 }
 0x399   : > { %1922 = vrsqrt.f32 %v1223_v28  ;;  %v1193_v33 = vpop.xlane.xlu1 %1192  ;;  %v1911_v34 = vpop.eup %1910  ;;  %1284 = vst [vmem:[%s2445_s11 + $0x40] sm:$0xff] %v1268_v29  ;;  %v1245_v35 = vmul.f32 %v1909_v30, %v2511_v57  ;;  %v1217_v37 = vmax.f32 %v1191_v48, 1e-24 }
 0x39a   : > { %v1218_v36 = vmax.f32 %v1193_v33, 1e-24  ;;  %v1253_v38 = vmul.f32 %v1911_v34, %v2516_v1 }
 0x39b   : > { %v1261_v39 = vmax.f32 %v1245_v35, 0.0 }
 0x39c   : > { %1924 = vrsqrt.f32 %v1218_v36  ;;  %v1913_v56 = vpop.eup %1912  ;;  %v1269_v40 = vmax.f32 %v1253_v38, 0.0  ;;  %v1207_v44 = vpop.xlane.xlu0 %1206 }
 0x39d   : > { %1926 = vrsqrt.f32 %v1217_v37  ;;  %v1209_v42 = vpop.xlane.xlu1 %1208  ;;  %v1915_v45 = vpop.eup %1914  ;;  %1277 = vst [vmem:[%s2445_s11 + $0x8] sm:$0xff] %v1261_v39  ;;  %v1254_v47 = vmul.f32 %v1913_v56, %v2526_v11  ;;  %v1225_v57 = vmax.f32 %v1207_v44, 1e-24 }
 0x39e   : > { %v1226_v49 = vmax.f32 %v1209_v42, 1e-24  ;;  %1285 = vst [vmem:[%s2445_s11 + $0x48] sm:$0xff] %v1269_v40  ;;  %v1246_v50 = vmul.f32 %v1915_v45, %v2521_v5 }
 0x39f   : > { %v1270_v51 = vmax.f32 %v1254_v47, 0.0 }
 0x3a0   : > { %1928 = vrsqrt.f32 %v1226_v49  ;;  %v1262_v53 = vmax.f32 %v1246_v50, 0.0  ;;  %v1195_v55 = vpop.xlane.xlu0 %1194 }
 0x3a1   : > { %v1917_v1 = vpop.eup %1916  ;;  %1930 = vrsqrt.f32 %v1225_v57  ;;  %1286 = vst [vmem:[%s2445_s11 + $0x50] sm:$0xff] %v1270_v51  ;;  %v1219_v61 = vmax.f32 %v1195_v55, 1e-24 }
 0x3a2   : > { %v1919_v58 = vpop.eup %1918  ;;  %v1248_v59 = vmul.f32 %v1917_v1, %v2536_v21  ;;  %1278 = vst [vmem:[%s2445_s11 + $0x10] sm:$0xff] %v1262_v53 }
 0x3a3   : > { %v1247_v11 = vmul.f32 %v1919_v58, %v2529_v12  ;;  %1932 = vrsqrt.f32 %v1219_v61 }
 0x3a4   : > { %v1264_v62 = vmax.f32 %v1248_v59, 0.0  ;;  %v1211_v0 = vpop.xlane.xlu0 %1210 }
 0x3a5   : > { %v1921_v5 = vpop.eup %1920  ;;  %v1263_v63 = vmax.f32 %v1247_v11, 0.0  ;;  %v1227_v4 = vmax.f32 %v1211_v0, 1e-24 }
 0x3a6   : > { %v1923_v2 = vpop.eup %1922  ;;  %1280 = vst [vmem:[%s2445_s11 + $0x20] sm:$0xff] %v1264_v62  ;;  %v1256_v3 = vmul.f32 %v1921_v5, %v2546_v31 }
 0x3a7   : > { %1279 = vst [vmem:[%s2445_s11 + $0x18] sm:$0xff] %v1263_v63  ;;  %v1255_v21 = vmul.f32 %v1923_v2, %v2541_v25  ;;  %1934 = vrsqrt.f32 %v1227_v4 }
 0x3a8   : > { %v1272_v6 = vmax.f32 %v1256_v3, 0.0 }
 0x3a9   : > { %v1925_v12 = vpop.eup %1924  ;;  %v1271_v7 = vmax.f32 %v1255_v21, 0.0 }
 0x3aa   : > { %v1927_v8 = vpop.eup %1926  ;;  %1288 = vst [vmem:[%s2445_s11 + $0x60] sm:$0xff] %v1272_v6  ;;  %v1250_v43 = vmul.f32 %v1925_v12, %v2556_v41 }
 0x3ab   : > { %1287 = vst [vmem:[%s2445_s11 + $0x58] sm:$0xff] %v1271_v7  ;;  %v1249_v9 = vmul.f32 %v1927_v8, %v2549_v32 }
 0x3ac   : > { %v1266_v31 = vmax.f32 %v1250_v43, 0.0 }
 0x3ad   : > { %v1929_v10 = vpop.eup %1928  ;;  %v1265_v13 = vmax.f32 %v1249_v9, 0.0 }
 0x3ae   : > { %v1931_v14 = vpop.eup %1930  ;;  %1282 = vst [vmem:[%s2445_s11 + $0x30] sm:$0xff] %v1266_v31  ;;  %v1258_v25 = vmul.f32 %v1929_v10, %v2566_v52 }
 0x3af   : > { %1281 = vst [vmem:[%s2445_s11 + $0x28] sm:$0xff] %v1265_v13  ;;  %v1257_v15 = vmul.f32 %v1931_v14, %v2561_v46 }
 0x3b0   : > { %v1274_v16 = vmax.f32 %v1258_v25, 0.0  ;;  %v1933_v17 = vpop.eup %1932 }
 0x3b1   : > { %v1273_v18 = vmax.f32 %v1257_v15, 0.0  ;;  %v1251_v41 = vmul.f32 %v1933_v17, %v2569_v54 }
 0x3b2   : > { %1290 = vst [vmem:[%s2445_s11 + $0x70] sm:$0xff] %v1274_v16 }
 0x3b3   : > { %1289 = vst [vmem:[%s2445_s11 + $0x68] sm:$0xff] %v1273_v18  ;;  %v1267_v32 = vmax.f32 %v1251_v41, 0.0 }
 0x3b4   : > { %v1935_v19 = vpop.eup %1934 }
 0x3b5   : > { %1283 = vst [vmem:[%s2445_s11 + $0x38] sm:$0xff] %v1267_v32  ;;  %v1259_v20 = vmul.f32 %v1935_v19, %v2576_v60 }
 0x3b7   : > { %v1275_v22 = vmax.f32 %v1259_v20, 0.0 }
 0x3b9   : > { %1291 = vst [vmem:[%s2445_s11 + $0x78] sm:$0xff] %v1275_v22 }
 0x3ba PF: > { %s2762_s1 = sld [smem:[#allocation18_spill]]  ;;  %s1306_s17 = sshll.u32 %s2445_s11, 4  ;;  %s2621_s17 = int_to_ptr.vmem [resolvable:$true] %s1306_s17 }
 0x3bb   : > { %s2763_s29 = sld [smem:[#allocation25_spill]]  ;;  %s1293_s16 = scalar_lea.sflag [#allocation6], %s2425_s6 }
 0x3bc   : > { %s2764_s27 = sld [smem:[#allocation32_spill]]  ;;  %s2014_s22 = scalar_lea.vmem %s2621_s17, 2048 }
 0x3bd   : > { %p2015_p1 = scmp.ne.s32.totalorder %s2621_s17, %s2014_s22  ;;  %s2169_s12 = smov [#allocation10]  }
 0x3be   : > { %s2018_s24 = sshll.u32 %s2169_s12, 4  ;;  %s2019_s24 = int_to_ptr.vmem [resolvable:$false] %s2018_s24 }
 0x3bf   : > { %s2020_s18 = scalar_lea.vmem %s2019_s24, 4096  ;;  %p2021_p3 = scmp.lt.s32.totalorder %s2621_s17, %s2019_s24 }
 0x3c0   : > { %s1504_s0 = sshll.u32 %s2762_s1, 11  ;;  %p2022_p7 = scmp.lt.s32.totalorder %s2020_s18, %s2014_s22 }
 0x3c1   : > { %p2766_p5 = scmp.ne.s32.totalorder %s2763_s29, 0 }
 0x3c2   : > { %s2765_s3 = smov %s2764_s27  ;;  %s2618_s30 = scalar_lea.hbm %s2764_s27, %s1504_s0 }
 0x3c3   : > { %p2016_p8 = pnand %p2015_p1, %p2766_p5  ;;  %p2023_p10 = por %p2022_p7, %p2021_p3 }
 0x3c5   : > { %p2017_p2 = pneg %p2016_p8 }
 0x3c7   : > { %p2024_p0 = pnand %p2023_p10, %p2017_p2 }
 0x3c9   : > { %2027 = shalt.err (!%p2024_p0)
}
 0x3ca   : > { %s2028_s20 = scalar_lea.hbm %s2618_s30, 2048  ;;  %s2032_s14 = scalar_lea.hbm %s2765_s3, 4096 }
 0x3cb   : > { %p2029_p12 = scmp.ne.s32.totalorder %s2618_s30, %s2028_s20  ;;  %p2033_p11 = scmp.lt.s32.totalorder %s2618_s30, %s2765_s3 }
 0x3cc   : > { %p2034_p13 = scmp.lt.s32.totalorder %s2032_s14, %s2028_s20 }
 0x3cd   : > { %p2030_p6 = pnand %p2029_p12, %p2766_p5 }
 0x3ce   : > { %p2035_p4 = por %p2034_p13, %p2033_p11 }
 0x3cf   : > { %p2031_p9 = pneg %p2030_p6 }
 0x3d1   : > { %p2036_p1 = pnand %p2035_p4, %p2031_p9 }
 0x3d3   : > { %2039 = shalt.err (!%p2036_p1)
}
 0x3d4   : > { %s2170_s5 = smov 128   ;;  %s2171_s21 = smov 8  }
 0x3d5   : > { %1728 = dma.vmem_to_hbm [thread:$0]  (%p2766_p5), %s2621_s17, 2048, %s2618_s30, %s1293_s16, %s2170_s5, %s2170_s5, %s2171_s21  }
 0x3d6 PF: > { %s2767_s1 = sld [smem:[#allocation15_spill]]  ;;  %p1740_p8 = scmp.ge.s32.totalorder %s2158_s9, 2 }
 0x3d7   : > { %s2768_s0 = sld [smem:[#allocation26_spill]] }
 0x3dc   : > { %s1321_s15 = sand.u32 1, %s2767_s1  }
 0x3dd   : > { %p2769_p2 = scmp.ne.s32.totalorder %s2768_s0, 0  ;;  %s1322_s19 = scalar_lea.sflag [#allocation6], %s1321_s15 }
 0x3df   : > { %p1735_p3 = pnand %p1740_p8, %p2769_p2 }
 0x3e1   : > { %p1736_p7 = pneg %p1735_p3 }
 0x3e3   : > { %2105 = dma.done.wait (%p1736_p7), %s1322_s19, 2048  }
 0x3e4   : > { %2107 = vsyncadd (%p1736_p7), %s1322_s19, 4294965248  ;;  %s25_s9 = sadd.s32 1, %s2158_s9   ;;  %s2771_s21 = sld [smem:[#allocation16_spill]] }
 0x3e5   : > { %p2651_p10 = scmp.ge.s32.totalorder %s25_s9, 6   ;;  %s2772_s6 = sld [smem:[#allocation23_spill]] }
 0x3e6   : > { %s2773_s29 = sld [smem:[#allocation21_spill]]  ;;  %s2778_s22 = smov %s2118_s23 }
 0x3e7   : > { %s2774_s30 = sld [smem:[#allocation22_spill]]  ;;  %s2780_s24 = smov %s2126_s25 }
 0x3e8   : > { %s2775_s17 = sld [smem:[#allocation19_spill]]  ;;  %s2781_s25 = smov %s2130_s26 }
 0x3e9   : > { %s2776_s16 = sld [smem:[#allocation20_spill]]  ;;  %s2783_s27 = smov %s2138_s28 }
 0x3eb   : > { %s2779_s23 = smov %s2772_s6  ;;  %24 = sbr.rel (!%p2651_p10) target bundleno = 19 (0x13), region = 166 }
 0x3ec   : > { %s2782_s26 = smov %s2773_s29  ;;  %s2785_s29 = smov %s2150_s7 }
 0x3ed   : > { %s2784_s28 = smov %s2774_s30  ;;  %s2786_s30 = smov %s2154_s8 }
 0x3ee   : > { %s2787_s7 = smov %s2775_s17 }
 0x3ef   : > { %s2788_s8 = smov %s2776_s16 }
 0x3f0   :  { %1327 = vsyncpa [#allocation5], 1 }
 0x3f1   :  { %1329 = vsyncpa [#allocation5 + $0x1], 1 }
 0x3f2   :  { %1330 = vsyncpa [#allocation8], 1 }
 0x3f3   :  { %1332 = vsyncpa [#allocation8 + $0x1], 1 }
 0x3f4   :  { %1333 = vsyncpa [#allocation6], 1 }
 0x3f5   :  { %1335 = vsyncpa [#allocation6 + $0x1], 1 }

</bundles_post_ra>
